<compile_context>
chip_gen: v7x
topology: tpu7x:2x2x1
jax: 0.10.0
libtpu: 0.0.40
codegen_flags: <defaults>
</compile_context>

<pallas_src>
import functools

import jax
import jax.numpy as jnp
from jax.experimental import pallas as pl
from jax.experimental.pallas import tpu as pltpu


TILE_B = 8          # samples per grid step (multiple of 8 -> aligned slices)


# ----------------------------------------------------------------------------
# Fused Pallas kernel:  conv(im2col matmul) + bias + ReLU + flatten + linear
# Per grid step: one TILE_B-sample batch tile.
# ----------------------------------------------------------------------------
def _fused_forward_kernel(a_ref, wc_ref, bc_ref, wl_ref, bl_ref, o_ref, *,
                          tile_b, n_oc, hw_pad, out_f):
    # ---- Conv2d as ONE lane-dense MXU matmul -------------------------------
    # wc: [OC, K_pad]   a: [K_pad, TILE_B*HWp]   ->   y: [OC, TILE_B*HWp]
    y = jnp.dot(wc_ref[...], a_ref[...], preferred_element_type=jnp.float32)
    y = jnp.maximum(y + bc_ref[...], 0.0)              # bias + ReLU (f32)

    # ---- Single bulk relayout: (oc, n, hw) rows stay row-major -------------
    # [OC, TILE_B*HWp] -> [OC*TILE_B, HWp]; row oc*TILE_B + n holds sample n's
    # [HWp] activation for channel oc (PyTorch (c, h, w) flatten order).
    y2 = y.reshape(n_oc * tile_b, hw_pad)

    # ---- Linear: OC matmuls with batch on the M axis -----------------------
    # wl[oc]: [HWp, OUT] (zero rows at padded hw positions -> padding is inert)
    acc = jnp.zeros((tile_b, out_f), jnp.float32)
    for oc in range(n_oc):                              # small static loop (OC=8)
        acc = acc + jnp.dot(y2[oc * tile_b:(oc + 1) * tile_b, :], wl_ref[oc],
                            preferred_element_type=jnp.float32)
    o_ref[...] = (acc + bl_ref[...]).astype(o_ref.dtype)   # bias once, direct store


# ----------------------------------------------------------------------------
# Glue: im2col (pure reshuffling, no FLOPs) — runs under jit, feeds the kernel
# ----------------------------------------------------------------------------
def _im2col_padded(x_nchw, kh, kw, k_pad, hw_pad):
    """Return [K_pad, N*HWp]; rows (kh, kw, c) zero-padded to K_pad, columns
    are per-sample blocks of width HWp (first HW real, rest zero)."""
    n, c, h, w = x_nchw.shape
    ho, wo = h - kh + 1, w - kw + 1
    hw = ho * wo
    taps = []
    for i in range(kh):
        for j in range(kw):
            taps.append(x_nchw[:, :, i:i + ho, j:j + wo])   # [N, C, Ho, Wo]
    p = jnp.stack(taps, axis=0)                              # [T, N, C, Ho, Wo]
    p = jnp.transpose(p, (0, 2, 1, 3, 4))                    # [T, C, N, Ho, Wo]
    p = p.reshape(kh * kw * c, n, hw)                        # [K, N, HW]
    p = jnp.pad(p, ((0, k_pad - kh * kw * c), (0, 0), (0, hw_pad - hw)))
    return p.reshape(k_pad, n * hw_pad)


# ----------------------------------------------------------------------------
# BaseNet-style parameter init:  xavier_uniform(weight), constant_(bias, 0.1)
# ----------------------------------------------------------------------------
def xavier_uniform(key, shape, fan_in, fan_out):
    bound = (6.0 / (fan_in + fan_out)) ** 0.5
    return jax.random.uniform(key, shape, jnp.float32, -bound, bound)


def init_params(key, c_in, c_out, kh, kw, h, w, out_features):
    ho, wo = h - kh + 1, w - kw + 1
    f = c_out * ho * wo
    k_conv, k_lin = jax.random.split(key)
    conv_w = xavier_uniform(k_conv, (c_out, c_in, kh, kw),
                            fan_in=c_in * kh * kw, fan_out=c_out * kh * kw)
    conv_b = jnp.full((c_out,), 0.1, jnp.float32)
    lin_w = xavier_uniform(k_lin, (out_features, f), fan_in=f, fan_out=out_features)
    lin_b = jnp.full((out_features,), 0.1, jnp.float32)
    return conv_w, conv_b, lin_w, lin_b


def prepare_kernel_params(conv_w, conv_b, lin_w, lin_b, h, w):
    """Fold every layout transpose + alignment padding into the params ONCE."""
    oc, c, kh, kw = conv_w.shape
    ho, wo = h - kh + 1, w - kw + 1
    hw = ho * wo
    out_f = lin_w.shape[0]
    k = kh * kw * c
    k_pad = ((k + 7) // 8) * 8                       # 36 -> 40 (sublane align)
    hw_pad = ((hw + 127) // 128) * 128               # 196 -> 256 (lane align)
    # Conv weight as matmul LHS: [OC, K_pad], column order (kh, kw, c), zero pad.
    wc = jnp.transpose(conv_w, (0, 2, 3, 1)).reshape(oc, k)
    wc = jnp.pad(wc, ((0, 0), (0, k_pad - k)))
    bc = conv_b.reshape(oc, 1)
    # Linear weight as [OC, HWp, OUT]; wl[oc, hw, f] == lin_w[f, oc*HW + hw];
    # rows at padded hw positions are ZERO (correctness under hw padding).
    wl = jnp.transpose(lin_w.reshape(out_f, oc, hw), (1, 2, 0))
    wl = jnp.pad(wl, ((0, 0), (0, hw_pad - hw), (0, 0)))
    bl = lin_b.reshape(1, out_f)
    return wc, bc, wl, bl


# ----------------------------------------------------------------------------
# Forward pass: jitted, single fused Pallas kernel, batch grid ("parallel")
# ----------------------------------------------------------------------------
@functools.partial(jax.jit, static_argnames=("kh", "kw"))
def basenet_forward(x_nchw, wc, bc, wl, bl, *, kh, kw):
    n, c, h, w = x_nchw.shape
    oc, k_pad = wc.shape
    hw_pad = wl.shape[1]
    out_f = bl.shape[1]

    tile_b = TILE_B
    n_pad = ((n + tile_b - 1) // tile_b) * tile_b
    x_p = jnp.pad(x_nchw, ((0, n_pad - n), (0, 0), (0, 0), (0, 0)))
    a_t = _im2col_padded(x_p, kh, kw, k_pad, hw_pad)      # [K_pad, N_pad*HWp]

    grid = (n_pad // tile_b,)
    kernel = functools.partial(_fused_forward_kernel, tile_b=tile_b,
                               n_oc=oc, hw_pad=hw_pad, out_f=out_f)

    flops = 2 * oc * k_pad * n_pad * hw_pad + 2 * n_pad * oc * hw_pad * out_f
    bytes_accessed = 4 * (k_pad * n_pad * hw_pad + oc * k_pad + oc
                          + oc * hw_pad * out_f + out_f + n_pad * out_f)

    out = pl.pallas_call(
        kernel,
        out_shape=jax.ShapeDtypeStruct((n_pad, out_f), jnp.float32),
        grid=grid,
        in_specs=[
            pl.BlockSpec((k_pad, tile_b * hw_pad), lambda b: (0, b)),   # a_t tile
            pl.BlockSpec((oc, k_pad), lambda b: (0, 0)),                # conv w
            pl.BlockSpec((oc, 1), lambda b: (0, 0)),                    # conv b
            pl.BlockSpec((oc, hw_pad, out_f), lambda b: (0, 0, 0)),     # lin w
            pl.BlockSpec((1, out_f), lambda b: (0, 0)),                 # lin b
        ],
        out_specs=pl.BlockSpec((tile_b, out_f), lambda b: (b, 0)),
        compiler_params=pltpu.CompilerParams(
            dimension_semantics=("parallel",)),
        cost_estimate=pl.CostEstimate(flops=flops, transcendentals=0,
                                      bytes_accessed=bytes_accessed),
    )(a_t, wc, bc, wl, bl)
    return out[:n]


# ----------------------------------------------------------------------------
# Pure-JAX reference (NCHW, mirrors PyTorch semantics)
# ----------------------------------------------------------------------------
def reference_forward(x_nchw, conv_w, conv_b, lin_w, lin_b):
    y = jax.lax.conv_general_dilated(
        x_nchw, conv_w, window_strides=(1, 1), padding="VALID",
        dimension_numbers=("NCHW", "OIHW", "NCHW"))
    y = jnp.maximum(y + conv_b.reshape(1, -1, 1, 1), 0.0)
    y = y.reshape(y.shape[0], -1)
    return y @ lin_w.T + lin_b


if __name__ == "__main__":
    N, C, H, W = 2, 4, 16, 16
    OC, KH, KW, OUT = 8, 3, 3, 16

    key = jax.random.PRNGKey(0)
    k_x, k_params = jax.random.split(key)
    x = jax.random.normal(k_x, (N, C, H, W), jnp.float32)
    conv_w, conv_b, lin_w, lin_b = init_params(k_params, C, OC, KH, KW, H, W, OUT)

    # Layout folding + alignment padding happens once, outside the per-call path.
    wc, bc, wl, bl = prepare_kernel_params(conv_w, conv_b, lin_w, lin_b, H, W)

    out = basenet_forward(x, wc, bc, wl, bl, kh=KH, kw=KW)
    out = jax.block_until_ready(out)

    ref = reference_forward(x, conv_w, conv_b, lin_w, lin_b)
    assert out.shape == (N, OUT)
    max_err = float(jnp.abs(out - ref).max())
    assert jnp.allclose(out, ref, atol=5e-4, rtol=5e-4), max_err

    print("KERNEL_OK")
</pallas_src>

<mosaic_0001>
module attributes {stable_mosaic.version = 11 : i64} {
  func.func @_fused_forward_kernel(%arg0: i32, %arg1: memref<40x2048xf32, #tpu.memory_space<vmem>>, %arg2: memref<8x40xf32, #tpu.memory_space<vmem>>, %arg3: memref<8x1xf32, #tpu.memory_space<vmem>>, %arg4: memref<8x256x16xf32, #tpu.memory_space<vmem>>, %arg5: memref<1x16xf32, #tpu.memory_space<vmem>>, %arg6: memref<8x16xf32, #tpu.memory_space<vmem>>) attributes {dimension_semantics = [#tpu.dimension_semantics<parallel>], iteration_bounds = array<i64: 1>, scalar_prefetch = 0 : i64, scratch_operands = 0 : i64, tpu.core_type = #tpu.core_type<tc>, window_params = [{transform_indices = @transform_0, window_bounds = array<i64: 40, 2048>}, {pipeline_mode = #tpu.pipeline_mode<synchronous>, transform_indices = @transform_1, window_bounds = array<i64: 8, 40>}, {pipeline_mode = #tpu.pipeline_mode<synchronous>, transform_indices = @transform_2, window_bounds = array<i64: 8, 1>}, {pipeline_mode = #tpu.pipeline_mode<synchronous>, transform_indices = @transform_3, window_bounds = array<i64: 8, 256, 16>}, {pipeline_mode = #tpu.pipeline_mode<synchronous>, transform_indices = @transform_4, window_bounds = array<i64: 1, 16>}, {transform_indices = @transform_5, window_bounds = array<i64: 8, 16>}]} {
    %c0 = arith.constant 0 : index
    %c0_0 = arith.constant 0 : index
    %0 = vector.load %arg2[%c0, %c0_0] : memref<8x40xf32, #tpu.memory_space<vmem>>, vector<8x40xf32>
    %c0_1 = arith.constant 0 : index
    %c0_2 = arith.constant 0 : index
    %1 = vector.load %arg1[%c0_1, %c0_2] : memref<40x2048xf32, #tpu.memory_space<vmem>>, vector<40x2048xf32>
    %cst = arith.constant dense<0.000000e+00> : vector<8x2048xf32>
    %2 = tpu.matmul %0, %1, %cst {dimension_numbers = #tpu.dot_dimension_numbers<[1], [0], [0], [1], [0, 0, 1, 1], [], []>} : vector<8x40xf32>, vector<40x2048xf32>, vector<8x2048xf32> -> vector<8x2048xf32>
    %c0_3 = arith.constant 0 : index
    %c0_4 = arith.constant 0 : index
    %3 = vector.load %arg3[%c0_3, %c0_4] : memref<8x1xf32, #tpu.memory_space<vmem>>, vector<8x1xf32>
    %4 = vector.broadcast %3 : vector<8x1xf32> to vector<8x2048xf32>
    %5 = arith.addf %2, %4 : vector<8x2048xf32>
    %cst_5 = arith.constant 0.000000e+00 : f32
    %6 = vector.broadcast %cst_5 : f32 to vector<8x2048xf32>
    %7 = arith.maximumf %5, %6 : vector<8x2048xf32>
    %8 = vector.shape_cast %7 : vector<8x2048xf32> to vector<64x256xf32>
    %cst_6 = arith.constant 0.000000e+00 : f32
    %9 = vector.broadcast %cst_6 : f32 to vector<8x16xf32>
    %10 = vector.extract_strided_slice %8 {offsets = [0, 0], sizes = [8, 256], strides = [1, 1]} : vector<64x256xf32> to vector<8x256xf32>
    %c0_7 = arith.constant 0 : index
    %c0_8 = arith.constant 0 : index
    %c0_9 = arith.constant 0 : index
    %11 = vector.load %arg4[%c0_7, %c0_8, %c0_9] : memref<8x256x16xf32, #tpu.memory_space<vmem>>, vector<1x256x16xf32>
    %12 = vector.shape_cast %11 : vector<1x256x16xf32> to vector<256x16xf32>
    %cst_10 = arith.constant dense<0.000000e+00> : vector<8x16xf32>
    %13 = tpu.matmul %10, %12, %cst_10 {dimension_numbers = #tpu.dot_dimension_numbers<[1], [0], [0], [1], [0, 0, 1, 1], [], []>} : vector<8x256xf32>, vector<256x16xf32>, vector<8x16xf32> -> vector<8x16xf32>
    %14 = arith.addf %9, %13 : vector<8x16xf32>
    %15 = vector.extract_strided_slice %8 {offsets = [8, 0], sizes = [8, 256], strides = [1, 1]} : vector<64x256xf32> to vector<8x256xf32>
    %c1 = arith.constant 1 : index
    %c0_11 = arith.constant 0 : index
    %c0_12 = arith.constant 0 : index
    %16 = vector.load %arg4[%c1, %c0_11, %c0_12] : memref<8x256x16xf32, #tpu.memory_space<vmem>>, vector<1x256x16xf32>
    %17 = vector.shape_cast %16 : vector<1x256x16xf32> to vector<256x16xf32>
    %cst_13 = arith.constant dense<0.000000e+00> : vector<8x16xf32>
    %18 = tpu.matmul %15, %17, %cst_13 {dimension_numbers = #tpu.dot_dimension_numbers<[1], [0], [0], [1], [0, 0, 1, 1], [], []>} : vector<8x256xf32>, vector<256x16xf32>, vector<8x16xf32> -> vector<8x16xf32>
    %19 = arith.addf %14, %18 : vector<8x16xf32>
    %20 = vector.extract_strided_slice %8 {offsets = [16, 0], sizes = [8, 256], strides = [1, 1]} : vector<64x256xf32> to vector<8x256xf32>
    %c2 = arith.constant 2 : index
    %c0_14 = arith.constant 0 : index
    %c0_15 = arith.constant 0 : index
    %21 = vector.load %arg4[%c2, %c0_14, %c0_15] : memref<8x256x16xf32, #tpu.memory_space<vmem>>, vector<1x256x16xf32>
    %22 = vector.shape_cast %21 : vector<1x256x16xf32> to vector<256x16xf32>
    %cst_16 = arith.constant dense<0.000000e+00> : vector<8x16xf32>
    %23 = tpu.matmul %20, %22, %cst_16 {dimension_numbers = #tpu.dot_dimension_numbers<[1], [0], [0], [1], [0, 0, 1, 1], [], []>} : vector<8x256xf32>, vector<256x16xf32>, vector<8x16xf32> -> vector<8x16xf32>
    %24 = arith.addf %19, %23 : vector<8x16xf32>
    %25 = vector.extract_strided_slice %8 {offsets = [24, 0], sizes = [8, 256], strides = [1, 1]} : vector<64x256xf32> to vector<8x256xf32>
    %c3 = arith.constant 3 : index
    %c0_17 = arith.constant 0 : index
    %c0_18 = arith.constant 0 : index
    %26 = vector.load %arg4[%c3, %c0_17, %c0_18] : memref<8x256x16xf32, #tpu.memory_space<vmem>>, vector<1x256x16xf32>
    %27 = vector.shape_cast %26 : vector<1x256x16xf32> to vector<256x16xf32>
    %cst_19 = arith.constant dense<0.000000e+00> : vector<8x16xf32>
    %28 = tpu.matmul %25, %27, %cst_19 {dimension_numbers = #tpu.dot_dimension_numbers<[1], [0], [0], [1], [0, 0, 1, 1], [], []>} : vector<8x256xf32>, vector<256x16xf32>, vector<8x16xf32> -> vector<8x16xf32>
    %29 = arith.addf %24, %28 : vector<8x16xf32>
    %30 = vector.extract_strided_slice %8 {offsets = [32, 0], sizes = [8, 256], strides = [1, 1]} : vector<64x256xf32> to vector<8x256xf32>
    %c4 = arith.constant 4 : index
    %c0_20 = arith.constant 0 : index
    %c0_21 = arith.constant 0 : index
    %31 = vector.load %arg4[%c4, %c0_20, %c0_21] : memref<8x256x16xf32, #tpu.memory_space<vmem>>, vector<1x256x16xf32>
    %32 = vector.shape_cast %31 : vector<1x256x16xf32> to vector<256x16xf32>
    %cst_22 = arith.constant dense<0.000000e+00> : vector<8x16xf32>
    %33 = tpu.matmul %30, %32, %cst_22 {dimension_numbers = #tpu.dot_dimension_numbers<[1], [0], [0], [1], [0, 0, 1, 1], [], []>} : vector<8x256xf32>, vector<256x16xf32>, vector<8x16xf32> -> vector<8x16xf32>
    %34 = arith.addf %29, %33 : vector<8x16xf32>
    %35 = vector.extract_strided_slice %8 {offsets = [40, 0], sizes = [8, 256], strides = [1, 1]} : vector<64x256xf32> to vector<8x256xf32>
    %c5 = arith.constant 5 : index
    %c0_23 = arith.constant 0 : index
    %c0_24 = arith.constant 0 : index
    %36 = vector.load %arg4[%c5, %c0_23, %c0_24] : memref<8x256x16xf32, #tpu.memory_space<vmem>>, vector<1x256x16xf32>
    %37 = vector.shape_cast %36 : vector<1x256x16xf32> to vector<256x16xf32>
    %cst_25 = arith.constant dense<0.000000e+00> : vector<8x16xf32>
    %38 = tpu.matmul %35, %37, %cst_25 {dimension_numbers = #tpu.dot_dimension_numbers<[1], [0], [0], [1], [0, 0, 1, 1], [], []>} : vector<8x256xf32>, vector<256x16xf32>, vector<8x16xf32> -> vector<8x16xf32>
    %39 = arith.addf %34, %38 : vector<8x16xf32>
    %40 = vector.extract_strided_slice %8 {offsets = [48, 0], sizes = [8, 256], strides = [1, 1]} : vector<64x256xf32> to vector<8x256xf32>
    %c6 = arith.constant 6 : index
    %c0_26 = arith.constant 0 : index
    %c0_27 = arith.constant 0 : index
    %41 = vector.load %arg4[%c6, %c0_26, %c0_27] : memref<8x256x16xf32, #tpu.memory_space<vmem>>, vector<1x256x16xf32>
    %42 = vector.shape_cast %41 : vector<1x256x16xf32> to vector<256x16xf32>
    %cst_28 = arith.constant dense<0.000000e+00> : vector<8x16xf32>
    %43 = tpu.matmul %40, %42, %cst_28 {dimension_numbers = #tpu.dot_dimension_numbers<[1], [0], [0], [1], [0, 0, 1, 1], [], []>} : vector<8x256xf32>, vector<256x16xf32>, vector<8x16xf32> -> vector<8x16xf32>
    %44 = arith.addf %39, %43 : vector<8x16xf32>
    %45 = vector.extract_strided_slice %8 {offsets = [56, 0], sizes = [8, 256], strides = [1, 1]} : vector<64x256xf32> to vector<8x256xf32>
    %c7 = arith.constant 7 : index
    %c0_29 = arith.constant 0 : index
    %c0_30 = arith.constant 0 : index
    %46 = vector.load %arg4[%c7, %c0_29, %c0_30] : memref<8x256x16xf32, #tpu.memory_space<vmem>>, vector<1x256x16xf32>
    %47 = vector.shape_cast %46 : vector<1x256x16xf32> to vector<256x16xf32>
    %cst_31 = arith.constant dense<0.000000e+00> : vector<8x16xf32>
    %48 = tpu.matmul %45, %47, %cst_31 {dimension_numbers = #tpu.dot_dimension_numbers<[1], [0], [0], [1], [0, 0, 1, 1], [], []>} : vector<8x256xf32>, vector<256x16xf32>, vector<8x16xf32> -> vector<8x16xf32>
    %49 = arith.addf %44, %48 : vector<8x16xf32>
    %c0_32 = arith.constant 0 : index
    %c0_33 = arith.constant 0 : index
    %50 = vector.load %arg5[%c0_32, %c0_33] : memref<1x16xf32, #tpu.memory_space<vmem>>, vector<1x16xf32>
    %51 = vector.broadcast %50 : vector<1x16xf32> to vector<8x16xf32>
    %52 = arith.addf %49, %51 : vector<8x16xf32>
    %c0_34 = arith.constant 0 : index
    %c0_35 = arith.constant 0 : index
    %53 = vector.load %arg6[%c0_34, %c0_35] : memref<8x16xf32, #tpu.memory_space<vmem>>, vector<8x16xf32>
    tpu.vector_store %arg6[%c0_34, %c0_35], %52 {strides = array<i32>} : memref<8x16xf32, #tpu.memory_space<vmem>>, vector<8x16xf32>,
    return
  }
  func.func @transform_0(%arg0: i32) -> (i32, i32) {
    %c0_i32 = arith.constant 0 : i32
    %c0_i32_0 = arith.constant 0 : i32
    return %c0_i32, %arg0 : i32, i32
  }
  func.func @transform_1(%arg0: i32) -> (i32, i32) {
    %c0_i32 = arith.constant 0 : i32
    %c0_i32_0 = arith.constant 0 : i32
    %c0_i32_1 = arith.constant 0 : i32
    return %c0_i32, %c0_i32_0 : i32, i32
  }
  func.func @transform_2(%arg0: i32) -> (i32, i32) {
    %c0_i32 = arith.constant 0 : i32
    %c0_i32_0 = arith.constant 0 : i32
    %c0_i32_1 = arith.constant 0 : i32
    return %c0_i32, %c0_i32_0 : i32, i32
  }
  func.func @transform_3(%arg0: i32) -> (i32, i32, i32) {
    %c0_i32 = arith.constant 0 : i32
    %c0_i32_0 = arith.constant 0 : i32
    %c0_i32_1 = arith.constant 0 : i32
    %c0_i32_2 = arith.constant 0 : i32
    return %c0_i32, %c0_i32_0, %c0_i32_1 : i32, i32, i32
  }
  func.func @transform_4(%arg0: i32) -> (i32, i32) {
    %c0_i32 = arith.constant 0 : i32
    %c0_i32_0 = arith.constant 0 : i32
    %c0_i32_1 = arith.constant 0 : i32
    return %c0_i32, %c0_i32_0 : i32, i32
  }
  func.func @transform_5(%arg0: i32) -> (i32, i32) {
    %c0_i32 = arith.constant 0 : i32
    %c0_i32_0 = arith.constant 0 : i32
    return %arg0, %c0_i32 : i32, i32
  }
}

</mosaic_0001>

<bundles_post_ra>
// kernel: basenet_forward.1
= control target key start
LH: loop header
LB: loop body
LE: loop exit
PB: predicated region body
PF: predicated region fallthrough
CT: control target
= control target key end

     0   :  { %v2839_v3 = vmov 0.0   ;;  %v2840_v8 = vmov 0   ;;  %vm107_vm0 = vcmask 326656   ;;  %vm1996_vm1 = vcmask 130048   ;;  %s4153_s0 = inlined_call_operand.vmem [shape: f32[40,2048], index: 0, kind: input, shape index: {}]   ;;  %s4154_s1 = inlined_call_operand.vmem [shape: f32[8,40], index: 1, kind: input, shape index: {}]   ;;  %s4155_s2 = inlined_call_operand.vmem [shape: f32[8,1], index: 2, kind: input, shape index: {}]   ;;  %s4156_s3 = inlined_call_operand.vmem [shape: f32[8,256,16], index: 3, kind: input, shape index: {}]   ;;  %s4157_s4 = inlined_call_operand.vmem [shape: f32[1,16], index: 4, kind: input, shape index: {}]   ;;  %s4158_s5 = inlined_call_operand.vmem [shape: f32[8,16], index: 5, kind: output, shape index: {}]  }
   0x1   :  { %v22_v0 = vld [vmem:[%s4153_s0 + $0x8] sm:$0xff]  ;;  %v24_v2 = vld [vmem:[%s4153_s0 + $0x18] sm:$0xff]  ;;  %175 = vmatprep.mubr.f32.mxu0 %v2839_v3  ;;  %246 = vmatprep.mubr.f32.mxu1 %v2839_v3  ;;  %v21_v6 = vld [vmem:[%s4153_s0] sm:$0xff] }
   0x2   :  { %v38_v1 = vld [vmem:[%s4153_s0 + $0x88] sm:$0xff]  ;;  %v40_v5 = vld [vmem:[%s4153_s0 + $0x98] sm:$0xff]  ;;  %v37_v7 = vld [vmem:[%s4153_s0 + $0x80] sm:$0xff]  ;;  %2838 = vset.pattern.permute.xlu0 %v2840_v8 }
   0x3   :  { %v2515_v4 = vpack.c.bf16 %v38_v1, %v22_v0  ;;  %v2523_v9 = vpack.c.bf16 %v40_v5, %v24_v2  ;;  %v2517_v10 = vpack.c.bf16 %v37_v7, %v21_v6  ;;  %v23_v11 = vld [vmem:[%s4153_s0 + $0x10] sm:$0xff]  ;;  %v54_v13 = vld [vmem:[%s4153_s0 + $0x108] sm:$0xff]  ;;  %v56_v16 = vld [vmem:[%s4153_s0 + $0x118] sm:$0xff] }
   0x4   :  { %v39_v12 = vld [vmem:[%s4153_s0 + $0x90] sm:$0xff]  ;;  %v70_v15 = vld [vmem:[%s4153_s0 + $0x188] sm:$0xff]  ;;  %v72_v17 = vld [vmem:[%s4153_s0 + $0x198] sm:$0xff] }
   0x5   :  { %2516 = vmatprep.subr.bf16.mxu0 %v2515_v4  ;;  %v2525_v14 = vpack.c.bf16 %v39_v12, %v23_v11  ;;  %2524 = vmatprep.subr.bf16.mxu1 %v2523_v9  ;;  %v2519_v18 = vpack.c.bf16 %v70_v15, %v54_v13  ;;  %v2527_v19 = vpack.c.bf16 %v72_v17, %v56_v16  ;;  %v53_v20 = vld [vmem:[%s4153_s0 + $0x100] sm:$0xff]  ;;  %v55_v22 = vld [vmem:[%s4153_s0 + $0x110] sm:$0xff]  ;;  %v86_v26 = vld [vmem:[%s4153_s0 + $0x208] sm:$0xff] }
   0x6   :  { %2518 = vmatpush1.bf16.msra.mxu0 %v2517_v10  ;;  %v69_v21 = vld [vmem:[%s4153_s0 + $0x180] sm:$0xff]  ;;  %v71_v24 = vld [vmem:[%s4153_s0 + $0x190] sm:$0xff]  ;;  %v88_v27 = vld [vmem:[%s4153_s0 + $0x218] sm:$0xff] }
   0x7   :  { %2526 = vmatpush1.bf16.msra.mxu1 %v2525_v14  ;;  %v2521_v23 = vpack.c.bf16 %v69_v21, %v53_v20  ;;  %2520 = vmatprep.subr.bf16.mxu0 %v2519_v18  ;;  %v2529_v25 = vpack.c.bf16 %v71_v24, %v55_v22  ;;  %v85_v28 = vld [vmem:[%s4153_s0 + $0x200] sm:$0xff]  ;;  %v26_v29 = vld [vmem:[%s4153_s0 + $0x28] sm:$0xff]  ;;  %v28_v31 = vld [vmem:[%s4153_s0 + $0x38] sm:$0xff] }
   0x8   :  { %2528 = vmatprep.subr.bf16.mxu1 %v2527_v19  ;;  %v42_v30 = vld [vmem:[%s4153_s0 + $0xa8] sm:$0xff]  ;;  %v87_v32 = vld [vmem:[%s4153_s0 + $0x210] sm:$0xff]  ;;  %v2946_v33 = vld [vmem:[%s4154_s1] sm:$0xff] }
   0x9   :  { %v44_v34 = vld [vmem:[%s4153_s0 + $0xb8] sm:$0xff]  ;;  %v25_v35 = vld [vmem:[%s4153_s0 + $0x20] sm:$0xff]  ;;  %v27_v37 = vld [vmem:[%s4153_s0 + $0x30] sm:$0xff]  ;;  %v2531_v40 = vpack.c.bf16 %v42_v30, %v26_v29 }
   0xa   :  { %2522 = vmatpush1.bf16.msra.mxu0 %v2521_v23  ;;  %v41_v36 = vld [vmem:[%s4153_s0 + $0xa0] sm:$0xff]  ;;  %v43_v38 = vld [vmem:[%s4153_s0 + $0xb0] sm:$0xff]  ;;  %v58_v39 = vld [vmem:[%s4153_s0 + $0x128] sm:$0xff]  ;;  %v2539_v44 = vpack.c.bf16 %v44_v34, %v28_v31 }
   0xb   :  { %2530 = vmatpush1.bf16.msra.mxu1 %v2529_v25  ;;  %119 = vmatprep.subr.mxu0 %v86_v26  ;;  %v74_v41 = vld [vmem:[%s4153_s0 + $0x1a8] sm:$0xff]  ;;  %v60_v42 = vld [vmem:[%s4153_s0 + $0x138] sm:$0xff]  ;;  %v2533_v45 = vpack.c.bf16 %v41_v36, %v25_v35  ;;  %v2541_v46 = vpack.c.bf16 %v43_v38, %v27_v37  ;;  %v57_v48 = vld [vmem:[%s4153_s0 + $0x120] sm:$0xff] }
   0xc   :  { %190 = vmatprep.subr.mxu1 %v88_v27  ;;  %v76_v43 = vld [vmem:[%s4153_s0 + $0x1b8] sm:$0xff]  ;;  %v2535_v47 = vpack.c.bf16 %v74_v41, %v58_v39  ;;  %v73_v49 = vld [vmem:[%s4153_s0 + $0x1a0] sm:$0xff]  ;;  %v59_v51 = vld [vmem:[%s4153_s0 + $0x130] sm:$0xff] }
   0xd   :  { %v2543_v50 = vpack.c.bf16 %v76_v43, %v60_v42  ;;  %v75_v52 = vld [vmem:[%s4153_s0 + $0x1b0] sm:$0xff]  ;;  %v2537_v53 = vpack.c.bf16 %v73_v49, %v57_v48  ;;  %v90_v55 = vld [vmem:[%s4153_s0 + $0x228] sm:$0xff]  ;;  %v92_v56 = vld [vmem:[%s4153_s0 + $0x238] sm:$0xff] }
   0xe   :  { %120 = vmatpush1.msra.mxu0 %v85_v28  ;;  %v2545_v54 = vpack.c.bf16 %v75_v52, %v59_v51  ;;  %v30_v57 = vld [vmem:[%s4153_s0 + $0x48] sm:$0xff]  ;;  %v89_v58 = vld [vmem:[%s4153_s0 + $0x220] sm:$0xff]  ;;  %v32_v60 = vld [vmem:[%s4153_s0 + $0x58] sm:$0xff] }
   0xf   :  { %191 = vmatpush1.msra.mxu1 %v87_v32  ;;  %2002 = vmatmul.mubr.msk.f32.vlgmr.msra.gmra.mrb[0].mxu0 %vm107_vm0, %v2946_v33  ;;  %v46_v59 = vld [vmem:[%s4153_s0 + $0xc8] sm:$0xff]  ;;  %v48_v61 = vld [vmem:[%s4153_s0 + $0xd8] sm:$0xff]  ;;  %v29_v62 = vld [vmem:[%s4153_s0 + $0x40] sm:$0xff] }
  0x10   :  { %2003 = vmatmul.mubr.msk.f32.vlgmr.msra.gmra.mrb[0].mxu1 %vm107_vm0, %v2946_v33  ;;  %2532 = vmatprep.subr.bf16.mxu0 %v2531_v40  ;;  %v45_v63 = vld [vmem:[%s4153_s0 + $0xc0] sm:$0xff]  ;;  %v31_v0 = vld [vmem:[%s4153_s0 + $0x50] sm:$0xff]  ;;  %v62_v2 = vld [vmem:[%s4153_s0 + $0x148] sm:$0xff]  ;;  %v2547_v6 = vpack.c.bf16 %v46_v59, %v30_v57  ;;  %v2555_v9 = vpack.c.bf16 %v48_v61, %v32_v60 }
  0x11   :  { %2540 = vmatprep.subr.bf16.mxu1 %v2539_v44  ;;  %2534 = vmatpush1.bf16.msra.mxu0 %v2533_v45  ;;  %v47_v1 = vld [vmem:[%s4153_s0 + $0xd0] sm:$0xff]  ;;  %v78_v4 = vld [vmem:[%s4153_s0 + $0x1c8] sm:$0xff]  ;;  %v64_v7 = vld [vmem:[%s4153_s0 + $0x158] sm:$0xff]  ;;  %v2549_v10 = vpack.c.bf16 %v45_v63, %v29_v62 }
  0x12   :  { %2542 = vmatpush1.bf16.msra.mxu1 %v2541_v46  ;;  %2536 = vmatprep.subr.bf16.mxu0 %v2535_v47  ;;  %v91_v5 = vld [vmem:[%s4153_s0 + $0x230] sm:$0xff]  ;;  %v80_v8 = vld [vmem:[%s4153_s0 + $0x1d8] sm:$0xff]  ;;  %v2557_v11 = vpack.c.bf16 %v47_v1, %v31_v0  ;;  %v2551_v12 = vpack.c.bf16 %v78_v4, %v62_v2  ;;  %v61_v13 = vld [vmem:[%s4153_s0 + $0x140] sm:$0xff] }
  0x13   :  { %2544 = vmatprep.subr.bf16.mxu1 %v2543_v50  ;;  %317 = vmatprep.mubr.f32.mxu0 %v2839_v3  ;;  %v77_v14 = vld [vmem:[%s4153_s0 + $0x1c0] sm:$0xff]  ;;  %v2559_v15 = vpack.c.bf16 %v80_v8, %v64_v7  ;;  %v63_v16 = vld [vmem:[%s4153_s0 + $0x150] sm:$0xff]  ;;  %v94_v21 = vld [vmem:[%s4153_s0 + $0x248] sm:$0xff] }
  0x14   :  { %388 = vmatprep.mubr.f32.mxu1 %v2839_v3  ;;  %v79_v17 = vld [vmem:[%s4153_s0 + $0x1d0] sm:$0xff]  ;;  %v2553_v18 = vpack.c.bf16 %v77_v14, %v61_v13  ;;  %v101_v20 = vld [vmem:[%s4155_s2] sm:$0xff]  ;;  %v96_v22 = vld [vmem:[%s4153_s0 + $0x258] sm:$0xff] }
  0x15   :  { %2538 = vmatpush1.bf16.msra.mxu0 %v2537_v53  ;;  %v2561_v19 = vpack.c.bf16 %v79_v17, %v63_v16  ;;  %v34_v23 = vld [vmem:[%s4153_s0 + $0x68] sm:$0xff]  ;;  %v93_v24 = vld [vmem:[%s4153_s0 + $0x240] sm:$0xff]  ;;  %v36_v26 = vld [vmem:[%s4153_s0 + $0x78] sm:$0xff]  ;;  %104 = vperm.xlu0 %2838, %v101_v20  }
  0x16   :  { %2546 = vmatpush1.bf16.msra.mxu1 %v2545_v54  ;;  %261 = vmatprep.subr.mxu0 %v90_v55  ;;  %v50_v25 = vld [vmem:[%s4153_s0 + $0xe8] sm:$0xff]  ;;  %v52_v27 = vld [vmem:[%s4153_s0 + $0xf8] sm:$0xff]  ;;  %v33_v28 = vld [vmem:[%s4153_s0 + $0x60] sm:$0xff] }
  0x17   :  { %332 = vmatprep.subr.mxu1 %v92_v56  ;;  %v49_v29 = vld [vmem:[%s4153_s0 + $0xe0] sm:$0xff]  ;;  %v35_v30 = vld [vmem:[%s4153_s0 + $0x70] sm:$0xff]  ;;  %v66_v32 = vld [vmem:[%s4153_s0 + $0x168] sm:$0xff]  ;;  %v2563_v36 = vpack.c.bf16 %v50_v25, %v34_v23  ;;  %v2571_v39 = vpack.c.bf16 %v52_v27, %v36_v26 }
  0x18   :  { %v51_v31 = vld [vmem:[%s4153_s0 + $0xf0] sm:$0xff]  ;;  %v82_v34 = vld [vmem:[%s4153_s0 + $0x1e8] sm:$0xff]  ;;  %v68_v37 = vld [vmem:[%s4153_s0 + $0x178] sm:$0xff]  ;;  %v2565_v40 = vpack.c.bf16 %v49_v29, %v33_v28 }
  0x19   :  { %262 = vmatpush1.msra.mxu0 %v89_v58  ;;  %v95_v35 = vld [vmem:[%s4153_s0 + $0x250] sm:$0xff]  ;;  %v84_v38 = vld [vmem:[%s4153_s0 + $0x1f8] sm:$0xff]  ;;  %v2573_v41 = vpack.c.bf16 %v51_v31, %v35_v30  ;;  %v2567_v42 = vpack.c.bf16 %v82_v34, %v66_v32  ;;  %v65_v43 = vld [vmem:[%s4153_s0 + $0x160] sm:$0xff] }
  0x1a   :  { %333 = vmatpush1.msra.mxu1 %v91_v5  ;;  %2004 = vmatmul.mubr.msk.f32.vlgmr.msra.gmra.mrb[2].mxu0 %vm107_vm0, %v2946_v33  ;;  %v81_v44 = vld [vmem:[%s4153_s0 + $0x1e0] sm:$0xff]  ;;  %v2575_v45 = vpack.c.bf16 %v84_v38, %v68_v37  ;;  %v67_v46 = vld [vmem:[%s4153_s0 + $0x170] sm:$0xff]  ;;  %v98_v50 = vld [vmem:[%s4153_s0 + $0x268] sm:$0xff] }
  0x1b   :  { %2005 = vmatmul.mubr.msk.f32.vlgmr.msra.gmra.mrb[2].mxu1 %vm107_vm0, %v2946_v33  ;;  %2548 = vmatprep.subr.bf16.mxu0 %v2547_v6  ;;  %v83_v47 = vld [vmem:[%s4153_s0 + $0x1f0] sm:$0xff]  ;;  %v2569_v48 = vpack.c.bf16 %v81_v44, %v65_v43  ;;  %v100_v51 = vld [vmem:[%s4153_s0 + $0x278] sm:$0xff]  ;;  %v97_v52 = vld [vmem:[%s4153_s0 + $0x260] sm:$0xff] }
  0x1c   :  { %2556 = vmatprep.subr.bf16.mxu1 %v2555_v9  ;;  %2550 = vmatpush1.bf16.msra.mxu0 %v2549_v10  ;;  %v2577_v49 = vpack.c.bf16 %v83_v47, %v67_v46  ;;  %v99_v53 = vld [vmem:[%s4153_s0 + $0x270] sm:$0xff]  ;;  %v2027_v54 = vld [vmem:[%s4156_s3 + $0x188] sm:$0xff]  ;;  %v1127_v55 = vld [vmem:[%s4156_s3 + $0x80] sm:$0xff] }
  0x1d   :  { %2558 = vmatpush1.bf16.msra.mxu1 %v2557_v11  ;;  %2552 = vmatprep.subr.bf16.mxu0 %v2551_v12  ;;  %v1128_v57 = vld [vmem:[%s4156_s3 + $0x88] sm:$0xff]  ;;  %v1111_v61 = vld [vmem:[%s4156_s3] sm:$0xff]  ;;  %v2028_v0 = vld [vmem:[%s4156_s3 + $0x190] sm:$0xff] }
  0x1e   :  { %2560 = vmatprep.subr.bf16.mxu1 %v2559_v15  ;;  %459 = vmatprep.mubr.f32.mxu0 %v2839_v3  ;;  %v2011_v58 = vld [vmem:[%s4156_s3 + $0x108] sm:$0xff]  ;;  %v2611_v59 = vpack.c.bf16 %v1128_v57, %v1127_v55  ;;  %v2029_v1 = vld [vmem:[%s4156_s3 + $0x198] sm:$0xff]  ;;  %v1129_v2 = vld [vmem:[%s4156_s3 + $0x90] sm:$0xff] }
  0x1f   :  { %530 = vmatprep.mubr.f32.mxu1 %v2839_v3  ;;  %v1112_v62 = vld [vmem:[%s4156_s3 + $0x8] sm:$0xff]  ;;  %v2583_v4 = vpack.c.bf16 %v2029_v1, %v2028_v0  ;;  %v1130_v5 = vld [vmem:[%s4156_s3 + $0x98] sm:$0xff]  ;;  %v2012_v6 = vld [vmem:[%s4156_s3 + $0x110] sm:$0xff] }
  0x20   :  { %2554 = vmatpush1.bf16.msra.mxu0 %v2553_v18  ;;  %v2613_v63 = vpack.c.bf16 %v1112_v62, %v1111_v61  ;;  %v2013_v7 = vld [vmem:[%s4156_s3 + $0x118] sm:$0xff]  ;;  %v2615_v8 = vpack.c.bf16 %v1130_v5, %v1129_v2  ;;  %v1113_v10 = vld [vmem:[%s4156_s3 + $0x10] sm:$0xff]  ;;  %v2030_v13 = vld [vmem:[%s4156_s3 + $0x1a0] sm:$0xff] }
  0x21   :  { %2562 = vmatpush1.bf16.msra.mxu1 %v2561_v19  ;;  %403 = vmatprep.subr.mxu0 %v94_v21  ;;  %v2585_v9 = vpack.c.bf16 %v2013_v7, %v2012_v6  ;;  %v1114_v11 = vld [vmem:[%s4156_s3 + $0x18] sm:$0xff]  ;;  %v2031_v14 = vld [vmem:[%s4156_s3 + $0x1a8] sm:$0xff]  ;;  %v1131_v15 = vld [vmem:[%s4156_s3 + $0xa0] sm:$0xff] }
  0x22   :  { %474 = vmatprep.subr.mxu1 %v96_v22  ;;  %v2617_v12 = vpack.c.bf16 %v1114_v11, %v1113_v10  ;;  %v2587_v16 = vpack.c.bf16 %v2031_v14, %v2030_v13  ;;  %v1132_v17 = vld [vmem:[%s4156_s3 + $0xa8] sm:$0xff]  ;;  %v2014_v18 = vld [vmem:[%s4156_s3 + $0x120] sm:$0xff]  ;;  %v2032_v25 = vld [vmem:[%s4156_s3 + $0x1b0] sm:$0xff] }
  0x23   :  { %v2015_v19 = vld [vmem:[%s4156_s3 + $0x128] sm:$0xff]  ;;  %v2619_v20 = vpack.c.bf16 %v1132_v17, %v1131_v15  ;;  %v1115_v22 = vld [vmem:[%s4156_s3 + $0x20] sm:$0xff]  ;;  %v2033_v26 = vld [vmem:[%s4156_s3 + $0x1b8] sm:$0xff] }
  0x24   :  { %404 = vmatpush1.msra.mxu0 %v93_v24  ;;  %v2589_v21 = vpack.c.bf16 %v2015_v19, %v2014_v18  ;;  %v1116_v23 = vld [vmem:[%s4156_s3 + $0x28] sm:$0xff]  ;;  %v1133_v27 = vld [vmem:[%s4156_s3 + $0xb0] sm:$0xff]  ;;  %v2591_v28 = vpack.c.bf16 %v2033_v26, %v2032_v25  ;;  %v1134_v29 = vld [vmem:[%s4156_s3 + $0xb8] sm:$0xff] }
  0x25   :  { %475 = vmatpush1.msra.mxu1 %v95_v35  ;;  %2006 = vmatmul.mubr.msk.f32.vlgmr.msra.gmra.mrb[4].mxu0 %vm107_vm0, %v2946_v33  ;;  %v2621_v24 = vpack.c.bf16 %v1116_v23, %v1115_v22  ;;  %v2016_v30 = vld [vmem:[%s4156_s3 + $0x130] sm:$0xff]  ;;  %v2017_v31 = vld [vmem:[%s4156_s3 + $0x138] sm:$0xff]  ;;  %v2623_v32 = vpack.c.bf16 %v1134_v29, %v1133_v27  ;;  %v2034_v38 = vld [vmem:[%s4156_s3 + $0x1c0] sm:$0xff]  ;;  %v2841_v27 = vmov 1966171168   ;;  %v722_v29 = vlaneseq }
  0x26   :  { %2007 = vmatmul.mubr.msk.f32.vlgmr.msra.gmra.mrb[4].mxu1 %vm107_vm0, %v2946_v33  ;;  %2564 = vmatprep.subr.bf16.mxu0 %v2563_v36  ;;  %v2593_v34 = vpack.c.bf16 %v2017_v31, %v2016_v30  ;;  %v1117_v35 = vld [vmem:[%s4156_s3 + $0x30] sm:$0xff]  ;;  %v1118_v36 = vld [vmem:[%s4156_s3 + $0x38] sm:$0xff]  ;;  %v2018_v43 = vld [vmem:[%s4156_s3 + $0x140] sm:$0xff] }
  0x27   :  { %2572 = vmatprep.subr.bf16.mxu1 %v2571_v39  ;;  %2566 = vmatpush1.bf16.msra.mxu0 %v2565_v40  ;;  %v2625_v37 = vpack.c.bf16 %v1118_v36, %v1117_v35  ;;  %v2035_v39 = vld [vmem:[%s4156_s3 + $0x1c8] sm:$0xff]  ;;  %v1135_v40 = vld [vmem:[%s4156_s3 + $0xc0] sm:$0xff]  ;;  %v2021_v55 = vld [vmem:[%s4156_s3 + $0x158] sm:$0xff] }
  0x28   :  { %2574 = vmatpush1.bf16.msra.mxu1 %v2573_v41  ;;  %2568 = vmatprep.subr.bf16.mxu0 %v2567_v42  ;;  %v2595_v41 = vpack.c.bf16 %v2035_v39, %v2034_v38  ;;  %v1136_v42 = vld [vmem:[%s4156_s3 + $0xc8] sm:$0xff]  ;;  %v1119_v47 = vld [vmem:[%s4156_s3 + $0x40] sm:$0xff]  ;;  %v2041_v10 = vld [vmem:[%s4156_s3 + $0x1f8] sm:$0xff] }
  0x29   :  { %2576 = vmatprep.subr.bf16.mxu1 %v2575_v45  ;;  %601 = vmatprep.mubr.f32.mxu0 %v2839_v3  ;;  %v2019_v44 = vld [vmem:[%s4156_s3 + $0x148] sm:$0xff]  ;;  %v2627_v45 = vpack.c.bf16 %v1136_v42, %v1135_v40  ;;  %v1139_v62 = vld [vmem:[%s4156_s3 + $0xe0] sm:$0xff]  ;;  %v1141_v11 = vld [vmem:[%s4156_s3 + $0xf0] sm:$0xff] }
  0x2a   :  { %672 = vmatprep.mubr.f32.mxu1 %v2839_v3  ;;  %v2026_v3 = vld [vmem:[%s4156_s3 + $0x180] sm:$0xff]  ;;  %v2597_v46 = vpack.c.bf16 %v2019_v44, %v2018_v43  ;;  %v2039_v61 = vld [vmem:[%s4156_s3 + $0x1e8] sm:$0xff]  ;;  %v2024_v15 = vld [vmem:[%s4156_s3 + $0x170] sm:$0xff] }
  0x2b   :  { %2570 = vmatpush1.bf16.msra.mxu0 %v2569_v48  ;;  %v2579_v56 = vpack.c.bf16 %v2027_v54, %v2026_v3  ;;  %v1120_v48 = vld [vmem:[%s4156_s3 + $0x48] sm:$0xff]  ;;  %v1138_v3 = vld [vmem:[%s4156_s3 + $0xd8] sm:$0xff]  ;;  %v2020_v54 = vld [vmem:[%s4156_s3 + $0x150] sm:$0xff] }
  0x2c   :  { %2578 = vmatpush1.bf16.msra.mxu1 %v2577_v49  ;;  %545 = vmatprep.subr.mxu0 %v98_v50  ;;  %v2629_v49 = vpack.c.bf16 %v1120_v48, %v1119_v47  ;;  %v2036_v50 = vld [vmem:[%s4156_s3 + $0x1d0] sm:$0xff]  ;;  %v2601_v57 = vpack.c.bf16 %v2021_v55, %v2020_v54  ;;  %v1140_v0 = vld [vmem:[%s4156_s3 + $0xe8] sm:$0xff]  ;;  %v2022_v1 = vld [vmem:[%s4156_s3 + $0x160] sm:$0xff] }
  0x2d   :  { %616 = vmatprep.subr.mxu1 %v100_v51  ;;  %v2037_v51 = vld [vmem:[%s4156_s3 + $0x1d8] sm:$0xff]  ;;  %v2023_v2 = vld [vmem:[%s4156_s3 + $0x168] sm:$0xff]  ;;  %v1123_v6 = vld [vmem:[%s4156_s3 + $0x60] sm:$0xff] }
  0x2e   :  { %v2605_v5 = vpack.c.bf16 %v2023_v2, %v2022_v1  ;;  %v1124_v7 = vld [vmem:[%s4156_s3 + $0x68] sm:$0xff]  ;;  %v1125_v17 = vld [vmem:[%s4156_s3 + $0x70] sm:$0xff]  ;;  %v1126_v19 = vld [vmem:[%s4156_s3 + $0x78] sm:$0xff] }
  0x2f   :  { %546 = vmatpush1.msra.mxu0 %v97_v52  ;;  %v1137_v52 = vld [vmem:[%s4156_s3 + $0xd0] sm:$0xff]  ;;  %v2059_v22 = vld [vmem:[%s4156_s3 + $0x288] sm:$0xff]  ;;  %v2090_v23 = vld [vmem:[%s4156_s3 + $0x380] sm:$0xff] }
  0x30   :  { %617 = vmatpush1.msra.mxu1 %v99_v53  ;;  %2008 = vmatmul.mubr.msk.f32.vlgmr.msra.gmra.mrb[6].mxu0 %vm107_vm0, %v2946_v33  ;;  %v2599_v53 = vpack.c.bf16 %v2037_v51, %v2036_v50  ;;  %v2091_v25 = vld [vmem:[%s4156_s3 + $0x388] sm:$0xff] }
  0x31   :  { %2009 = vmatmul.mubr.msk.f32.vlgmr.msra.gmra.mrb[6].mxu1 %vm107_vm0, %v2946_v33  ;;  %v2010_v33 = vld [vmem:[%s4156_s3 + $0x100] sm:$0xff]  ;;  %2580 = vmatprep.subr.bf16.mxu0 %v2579_v56  ;;  %v2631_v56 = vpack.c.bf16 %v1138_v3, %v1137_v52  ;;  %v2675_v26 = vpack.c.bf16 %v2091_v25, %v2090_v23 }
  0x32   :  { %v2581_v60 = vpack.c.bf16 %v2011_v58, %v2010_v33  ;;  %2612 = vmatprep.subr.bf16.mxu1 %v2611_v59  ;;  %v1121_v33 = vld [vmem:[%s4156_s3 + $0x50] sm:$0xff]  ;;  %v1122_v58 = vld [vmem:[%s4156_s3 + $0x58] sm:$0xff] }
  0x33   :  { %2614 = vmatpush3.bf16.msra.mxu1 %v2613_v63  ;;  %v2633_v59 = vpack.c.bf16 %v1122_v58, %v1121_v33 }
  0x34   :  { %2582 = vmatpush3.bf16.msra.mxu0 %v2581_v60  ;;  %2616 = vmatprep.subr.bf16.mxu1 %v2615_v8  ;;  %v2038_v60 = vld [vmem:[%s4156_s3 + $0x1e0] sm:$0xff]  ;;  %v2040_v8 = vld [vmem:[%s4156_s3 + $0x1f0] sm:$0xff] }
  0x35   :  { %2584 = vmatprep.subr.bf16.mxu0 %v2583_v4  ;;  %v2603_v63 = vpack.c.bf16 %v2039_v61, %v2038_v60  ;;  %v2635_v4 = vpack.c.bf16 %v1140_v0, %v1139_v62  ;;  %v2607_v13 = vpack.c.bf16 %v2041_v10, %v2040_v8 }
  0x37   :  { %2618 = vmatpush3.bf16.msra.mxu1 %v2617_v12  ;;  %v1142_v12 = vld [vmem:[%s4156_s3 + $0xf8] sm:$0xff] }
  0x38   :  { %2586 = vmatpush3.bf16.msra.mxu0 %v2585_v9  ;;  %2620 = vmatprep.subr.bf16.mxu1 %v2619_v20  ;;  %v2637_v9 = vpack.c.bf16 %v1124_v7, %v1123_v6  ;;  %v2639_v14 = vpack.c.bf16 %v1142_v12, %v1141_v11  ;;  %v2641_v20 = vpack.c.bf16 %v1126_v19, %v1125_v17 }
  0x39   :  { %2588 = vmatprep.subr.bf16.mxu0 %v2587_v16  ;;  %v2025_v16 = vld [vmem:[%s4156_s3 + $0x178] sm:$0xff] }
  0x3a   :  { %v2609_v18 = vpack.c.bf16 %v2025_v16, %v2024_v15 }
  0x3b   :  { %2622 = vmatpush3.bf16.msra.mxu1 %v2621_v24 }
  0x3c   :  { %2590 = vmatpush3.bf16.msra.mxu0 %v2589_v21  ;;  %2624 = vmatprep.subr.bf16.mxu1 %v2623_v32  ;;  %v2058_v21 = vld [vmem:[%s4156_s3 + $0x280] sm:$0xff] }
  0x3d   :  { %2592 = vmatprep.subr.bf16.mxu0 %v2591_v28  ;;  %v2643_v24 = vpack.c.bf16 %v2059_v22, %v2058_v21  ;;  %v720_v28 = vunpack.c.l.s4 %v2841_v27 }
  0x3f   :  { %2626 = vmatpush3.bf16.msra.mxu1 %v2625_v37  ;;  %v721_v32 = vunpack.c.0.s8 %v720_v28 }
  0x40   :  { %2594 = vmatpush3.bf16.msra.mxu0 %v2593_v34  ;;  %2628 = vmatprep.subr.bf16.mxu1 %v2627_v45  ;;  %v723_v34 = vshrl.u32 %v722_v29, 7 }
  0x41   :  { %2596 = vmatprep.subr.bf16.mxu0 %v2595_v41 }
  0x42   :  { %v3354_v44 = vsub.s32 %v721_v32, %v723_v34 }
  0x43   :  { %2630 = vmatpush3.bf16.msra.mxu1 %v2629_v49 }
  0x44   :  { %2598 = vmatpush3.bf16.msra.mxu0 %v2597_v46  ;;  %2632 = vmatprep.subr.bf16.mxu1 %v2631_v56 }
  0x45   :  { %2600 = vmatprep.subr.bf16.mxu0 %v2599_v53 }
  0x47   :  { %2634 = vmatpush3.bf16.msra.mxu1 %v2633_v59 }
  0x48   :  { %2602 = vmatpush3.bf16.msra.mxu0 %v2601_v57  ;;  %2636 = vmatprep.subr.bf16.mxu1 %v2635_v4 }
  0x49   :  { %2604 = vmatprep.subr.bf16.mxu0 %v2603_v63 }
  0x4b   :  { %2638 = vmatpush3.bf16.msra.mxu1 %v2637_v9 }
  0x4c   :  { %2606 = vmatpush3.bf16.msra.mxu0 %v2605_v5  ;;  %2640 = vmatprep.subr.bf16.mxu1 %v2639_v14 }
  0x4d   :  { %2608 = vmatprep.subr.bf16.mxu0 %v2607_v13 }
  0x4f   :  { %2642 = vmatpush3.bf16.msra.mxu1 %v2641_v20 }
  0x50   :  { %2610 = vmatpush3.bf16.msra.mxu0 %v2609_v18  ;;  %2676 = vmatprep.subr.bf16.mxu1 %v2675_v26 }
  0x51   :  { %2644 = vmatprep.subr.bf16.mxu0 %v2643_v24 }
  0x94   :  { %v3348_v30 = vpop.permute.xlu0 %104 }
  0xe2   :  { %v177_v31 = vpop.f32.mrb[0].mxu0 }
  0xe3   :  { %v248_v35 = vpop.f32.mrb[0].mxu1  ;;  %v178_v36 = vadd.f32 %v177_v31, %v3348_v30  ;;  %v179_v37 = vpop.f32.mrb[1].mxu0 }
  0xe4   :  { %v180_v38 = vadd.f32 %v179_v37, %v3348_v30  ;;  %v249_v39 = vadd.f32 %v248_v35, %v3348_v30  ;;  %v250_v40 = vpop.f32.mrb[1].mxu1 }
  0xe5   :  { %v679_v41 = vmax.f32 %v178_v36, 0.0  ;;  %v251_v42 = vadd.f32 %v250_v40, %v3348_v30 }
  0xe6   :  { %v680_v43 = vmax.f32 %v180_v38, 0.0  ;;  %v681_v45 = vmax.f32 %v249_v39, 0.0 }
  0xe7   :  { %v682_v46 = vmax.f32 %v251_v42, 0.0 }
  0xe8   :  { %v711_v47 = vcombine.low %v679_v41, %v680_v43  ;;  %v712_v48 = vcombine.high %v679_v41, %v680_v43 }
  0xe9   :  { %v713_v49 = vcombine.low %v681_v45, %v682_v46  ;;  %v714_v50 = vcombine.high %v681_v45, %v682_v46 }
  0xea   :  { %v725_v51 = vrot.slane %v711_v47, %v3354_v44  ;;  %v732_v52 = vrot.slane %v712_v48, %v3354_v44 }
  0xeb   :  { %v739_v53 = vrot.slane %v713_v49, %v3354_v44  ;;  %v746_v3 = vrot.slane %v714_v50, %v3354_v44 }
  0xed   :  { %v775_v54 = vcombine.low %v725_v51, %v739_v53  ;;  %v776_v55 = vcombine.high %v725_v51, %v739_v53  ;;  %v777_v56 = vcombine.low %v732_v52, %v746_v3  ;;  %v778_v57 = vcombine.high %v732_v52, %v746_v3  ;;  %v319_v33 = vpop.f32.mrb[2].mxu0 }
  0xee   :  { %v320_v58 = vadd.f32 %v319_v33, %v3348_v30  ;;  %v390_v59 = vpop.f32.mrb[2].mxu1  ;;  %v321_v60 = vpop.f32.mrb[3].mxu0 }
  0xef   :  { %v392_v61 = vpop.f32.mrb[3].mxu1  ;;  %v391_v63 = vadd.f32 %v390_v59, %v3348_v30  ;;  %v322_v0 = vadd.f32 %v321_v60, %v3348_v30  ;;  %v3369_v19 = vrot.slane %v775_v54, %v3354_v44  ;;  %v3372_v20 = vrot.slane %v777_v56, %v3354_v44 }
  0xf0   :  { %v683_v62 = vmax.f32 %v320_v58, 0.0  ;;  %v393_v1 = vadd.f32 %v392_v61, %v3348_v30  ;;  %v3375_v21 = vrot.slane %v776_v55, %v3354_v44  ;;  %v3404_v45 = vrot.slane %v778_v57, %v3354_v44 }
  0xf1   :  { %v685_v2 = vmax.f32 %v391_v63, 0.0  ;;  %v684_v4 = vmax.f32 %v322_v0, 0.0 }
  0xf2   :  { %v686_v5 = vmax.f32 %v393_v1, 0.0 }
  0xf3   :  { %v715_v6 = vcombine.low %v683_v62, %v684_v4  ;;  %v716_v7 = vcombine.high %v683_v62, %v684_v4 }
  0xf4   :  { %v717_v8 = vcombine.low %v685_v2, %v686_v5  ;;  %v718_v9 = vcombine.high %v685_v2, %v686_v5 }
  0xf5   :  { %v753_v10 = vrot.slane %v715_v6, %v3354_v44  ;;  %v760_v11 = vrot.slane %v716_v7, %v3354_v44  ;;  %v3429_v7 = vld [vmem:[%s4156_s3 + $0x200] sm:$0xff] }
  0xf6   :  { %v767_v12 = vrot.slane %v717_v8, %v3354_v44  ;;  %v774_v13 = vrot.slane %v718_v9, %v3354_v44  ;;  %v3434_v8 = vld [vmem:[%s4156_s3 + $0x208] sm:$0xff]  ;;  %v3439_v9 = vld [vmem:[%s4156_s3 + $0x300] sm:$0xff] }
  0xf8   :  { %v779_v14 = vcombine.low %v753_v10, %v767_v12  ;;  %v780_v15 = vcombine.high %v753_v10, %v767_v12  ;;  %v781_v16 = vcombine.low %v760_v11, %v774_v13  ;;  %v782_v17 = vcombine.high %v760_v11, %v774_v13  ;;  %v461_v18 = vpop.f32.mrb[4].mxu0  ;;  %v3449_v13 = vld [vmem:[%s4156_s3 + $0x290] sm:$0xff] }
  0xf9   :  { %v462_v22 = vadd.f32 %v461_v18, %v3348_v30  ;;  %v532_v23 = vpop.f32.mrb[4].mxu1  ;;  %v463_v24 = vpop.f32.mrb[5].mxu0 }
  0xfa   :  { %v3379_v25 = vrot.slane %v779_v14, %v3354_v44  ;;  %v3382_v26 = vrot.slane %v781_v16, %v3354_v44  ;;  %v3385_v27 = vrot.slane %v780_v15, %v3354_v44  ;;  %v3388_v28 = vrot.slane %v782_v17, %v3354_v44  ;;  %v534_v29 = vpop.f32.mrb[5].mxu1  ;;  %v3454_v14 = vld [vmem:[%s4156_s3 + $0x298] sm:$0xff]  ;;  %v3459_v15 = vld [vmem:[%s4156_s3 + $0x390] sm:$0xff] }
  0xfb   :  { %v687_v31 = vmax.f32 %v462_v22, 0.0  ;;  %v533_v32 = vadd.f32 %v532_v23, %v3348_v30  ;;  %v464_v34 = vadd.f32 %v463_v24, %v3348_v30  ;;  %v535_v35 = vadd.f32 %v534_v29, %v3348_v30  ;;  %v3464_v23 = vld [vmem:[%s4156_s3 + $0x398] sm:$0xff]  ;;  %v3469_v24 = vld [vmem:[%s4156_s3 + $0x210] sm:$0xff] }
  0xfc   :  { %v843_v36 = vcombine.low %v3375_v21, %v3385_v27  ;;  %v839_v37 = vcombine.low %v3369_v19, %v3379_v25  ;;  %v840_v38 = vcombine.high %v3369_v19, %v3379_v25  ;;  %v844_v39 = vcombine.high %v3375_v21, %v3385_v27  ;;  %v3474_v29 = vld [vmem:[%s4156_s3 + $0x218] sm:$0xff] }
  0xfd   :  { %v689_v40 = vmax.f32 %v533_v32, 0.0  ;;  %v688_v41 = vmax.f32 %v464_v34, 0.0  ;;  %v690_v42 = vmax.f32 %v535_v35, 0.0  ;;  %v841_v43 = vcombine.low %v3372_v20, %v3382_v26 }
  0xfe   :  { %v845_v50 = vcombine.low %v3404_v45, %v3388_v28  ;;  %v842_v51 = vcombine.high %v3372_v20, %v3382_v26  ;;  %v846_v52 = vcombine.high %v3404_v45, %v3388_v28  ;;  %v2647_v34 = vpack.c.bf16 %v3454_v14, %v3449_v13 }
  0xff   :  { %v847_v46 = vcombine.low %v687_v31, %v688_v41  ;;  %v848_v47 = vcombine.high %v687_v31, %v688_v41  ;;  %v849_v48 = vcombine.low %v689_v40, %v690_v42  ;;  %v850_v49 = vcombine.high %v689_v40, %v690_v42 }
 0x100   :  { %v3417_v56 = vrot.slane %v842_v51, %v3354_v44  ;;  %v3420_v57 = vrot.slane %v846_v52, %v3354_v44  ;;  %v2645_v31 = vpack.c.bf16 %v3434_v8, %v3429_v7  ;;  %v3516_v25 = vrot.slane %v841_v43, %v3354_v44 }
 0x101   :  { %v861_v53 = vrot.slane %v847_v46, %v3354_v44  ;;  %v868_v3 = vrot.slane %v848_v47, %v3354_v44  ;;  %v875_v54 = vrot.slane %v849_v48, %v3354_v44  ;;  %v882_v55 = vrot.slane %v850_v49, %v3354_v44 }
 0x102   :  { %v1019_v46 = vrot.slane %v843_v36, %v3354_v44  ;;  %v1005_v47 = vrot.slane %v839_v37, %v3354_v44  ;;  %v2679_v48 = vpack.c.bf16 %v3464_v23, %v3459_v15  ;;  %v2649_v49 = vpack.c.bf16 %v3474_v29, %v3469_v24  ;;  %v2048_v15 = vld [vmem:[%s4156_s3 + $0x230] sm:$0xff]  ;;  %v2049_v23 = vld [vmem:[%s4156_s3 + $0x238] sm:$0xff] }
 0x103   :  { %v911_v33 = vcombine.low %v861_v53, %v875_v54  ;;  %v912_v58 = vcombine.high %v861_v53, %v875_v54  ;;  %v913_v59 = vcombine.low %v868_v3, %v882_v55  ;;  %v914_v60 = vcombine.high %v868_v3, %v882_v55  ;;  %v603_v61 = vpop.f32.mrb[6].mxu0  ;;  %v2080_v24 = vld [vmem:[%s4156_s3 + $0x330] sm:$0xff]  ;;  %v2081_v29 = vld [vmem:[%s4156_s3 + $0x338] sm:$0xff] }
 0x104   :  { %v604_v62 = vadd.f32 %v603_v61, %v3348_v30  ;;  %v674_v63 = vpop.f32.mrb[6].mxu1  ;;  %v605_v0 = vpop.f32.mrb[7].mxu0  ;;  %v3498_v36 = vrot.slane %v840_v38, %v3354_v44  ;;  %v3504_v37 = vrot.slane %v844_v39, %v3354_v44  ;;  %v3522_v21 = vrot.slane %v845_v50, %v3354_v44 }
 0x105   :  { %v676_v1 = vpop.f32.mrb[7].mxu1  ;;  %v675_v4 = vadd.f32 %v674_v63, %v3348_v30  ;;  %v606_v5 = vadd.f32 %v605_v0, %v3348_v30  ;;  %v925_v54 = vrot.slane %v911_v33, %v3354_v44  ;;  %v939_v55 = vrot.slane %v912_v58, %v3354_v44 }
 0x106   :  { %v691_v2 = vmax.f32 %v604_v62, 0.0  ;;  %v677_v6 = vadd.f32 %v676_v1, %v3348_v30  ;;  %v3444_v30 = vld [vmem:[%s4156_s3 + $0x308] sm:$0xff]  ;;  %v932_v63 = vrot.slane %v913_v59, %v3354_v44  ;;  %v946_v19 = vrot.slane %v914_v60, %v3354_v44 }
 0x107   :  { %v693_v10 = vmax.f32 %v675_v4, 0.0  ;;  %v692_v11 = vmax.f32 %v606_v5, 0.0  ;;  %v2677_v32 = vpack.c.bf16 %v3444_v30, %v3439_v9  ;;  %v2078_v30 = vld [vmem:[%s4156_s3 + $0x320] sm:$0xff] }
 0x108   :  { %v694_v12 = vmax.f32 %v677_v6, 0.0 }
 0x109   :  { %v851_v16 = vcombine.low %v691_v2, %v692_v11  ;;  %v852_v17 = vcombine.high %v691_v2, %v692_v11 }
 0x10a   :  { %v853_v18 = vcombine.low %v693_v10, %v694_v12  ;;  %v854_v22 = vcombine.high %v693_v10, %v694_v12 }
 0x10b   :  { %v889_v35 = vrot.slane %v851_v16, %v3354_v44  ;;  %v896_v40 = vrot.slane %v852_v17, %v3354_v44 }
 0x10c   :  { %v903_v41 = vrot.slane %v853_v18, %v3354_v44  ;;  %v910_v42 = vrot.slane %v854_v22, %v3354_v44  ;;  %v2076_v18 = vld [vmem:[%s4156_s3 + $0x310] sm:$0xff]  ;;  %v2077_v22 = vld [vmem:[%s4156_s3 + $0x318] sm:$0xff] }
 0x10e   :  { %v915_v51 = vcombine.low %v889_v35, %v903_v41  ;;  %v916_v52 = vcombine.high %v889_v35, %v903_v41  ;;  %v917_v53 = vcombine.low %v896_v40, %v910_v42  ;;  %v918_v3 = vcombine.high %v896_v40, %v910_v42  ;;  %v2063_v41 = vld [vmem:[%s4156_s3 + $0x2a8] sm:$0xff]  ;;  %v2094_v42 = vld [vmem:[%s4156_s3 + $0x3a0] sm:$0xff] }
 0x110   :  { %v953_v61 = vrot.slane %v915_v51, %v3354_v44  ;;  %v960_v62 = vrot.slane %v917_v53, %v3354_v44  ;;  %v967_v33 = vrot.slane %v916_v52, %v3354_v44  ;;  %v974_v58 = vrot.slane %v918_v3, %v3354_v44 }
 0x112   :  { %v979_v27 = vcombine.low %v939_v55, %v967_v33  ;;  %v975_v38 = vcombine.low %v925_v54, %v953_v61  ;;  %v976_v39 = vcombine.high %v925_v54, %v953_v61  ;;  %v980_v0 = vcombine.high %v939_v55, %v967_v33  ;;  %v2046_v61 = vld [vmem:[%s4156_s3 + $0x220] sm:$0xff] }
 0x113   :  { %v977_v1 = vcombine.low %v932_v63, %v960_v62  ;;  %v981_v59 = vcombine.low %v946_v19, %v974_v58  ;;  %v978_v2 = vcombine.high %v932_v63, %v960_v62  ;;  %v982_v60 = vcombine.high %v946_v19, %v974_v58  ;;  %v2047_v62 = vld [vmem:[%s4156_s3 + $0x228] sm:$0xff]  ;;  %v2065_v58 = vld [vmem:[%s4156_s3 + $0x2b8] sm:$0xff]  ;;  %v2096_v63 = vld [vmem:[%s4156_s3 + $0x3b0] sm:$0xff] }
 0x114   :  { %v1026_v4 = vrot.slane %v979_v27, %v3354_v44  ;;  %v1012_v20 = vrot.slane %v975_v38, %v3354_v44  ;;  %v3527_v26 = vrot.slane %v976_v39, %v3354_v44  ;;  %v3530_v43 = vrot.slane %v980_v0, %v3354_v44  ;;  %v2097_v19 = vld [vmem:[%s4156_s3 + $0x3b8] sm:$0xff]  ;;  %v2067_v27 = vld [vmem:[%s4156_s3 + $0x2c8] sm:$0xff]  ;;  %v2098_v38 = vld [vmem:[%s4156_s3 + $0x3c0] sm:$0xff] }
 0x115   :  { %v3533_v28 = vrot.slane %v977_v1, %v3354_v44  ;;  %v3536_v45 = vrot.slane %v981_v59, %v3354_v44  ;;  %v3539_v50 = vrot.slane %v978_v2, %v3354_v44  ;;  %v3542_v5 = vrot.slane %v982_v60, %v3354_v44  ;;  %v2062_v44 = vld [vmem:[%s4156_s3 + $0x2a0] sm:$0xff]  ;;  %v2099_v39 = vld [vmem:[%s4156_s3 + $0x3c8] sm:$0xff] }
 0x116   :  { %v1179_v6 = vcombine.high %v1019_v46, %v1026_v4  ;;  %v1255_v10 = vcombine.high %v1005_v47, %v1012_v20  ;;  %v1178_v11 = vcombine.low %v1019_v46, %v1026_v4  ;;  %v1254_v12 = vcombine.low %v1005_v47, %v1012_v20  ;;  %v2095_v46 = vld [vmem:[%s4156_s3 + $0x3a8] sm:$0xff]  ;;  %v2050_v59 = vld [vmem:[%s4156_s3 + $0x240] sm:$0xff] }
 0x117   :  { %v1364_v16 = vcombine.high %v3498_v36, %v3527_v26  ;;  %v1474_v17 = vcombine.high %v3504_v37, %v3530_v43  ;;  %v1363_v35 = vcombine.low %v3498_v36, %v3527_v26  ;;  %v1473_v40 = vcombine.low %v3504_v37, %v3530_v43  ;;  %v2051_v2 = vld [vmem:[%s4156_s3 + $0x248] sm:$0xff]  ;;  %v2082_v20 = vld [vmem:[%s4156_s3 + $0x340] sm:$0xff] }
 0x118   :  { %1246 = vmatprep.mubr.f32.mxu0 %v1179_v6  ;;  %1322 = vmatprep.mubr.f32.mxu1 %v1255_v10  ;;  %v1584_v47 = vcombine.high %v3516_v25, %v3533_v28  ;;  %v1694_v51 = vcombine.high %v3522_v21, %v3536_v45  ;;  %v1583_v52 = vcombine.low %v3516_v25, %v3533_v28  ;;  %v2083_v6 = vld [vmem:[%s4156_s3 + $0x348] sm:$0xff]  ;;  %v2068_v10 = vld [vmem:[%s4156_s3 + $0x2d0] sm:$0xff]  ;;  %v2110_v26 = vld [vmem:[%s4156_s3 + $0x420] sm:$0xff] }
 0x119   :  { %1247 = vmatmul.mubr.f32.vlgmr.msra.gmra.mrb[8].mxu0 %v1178_v11  ;;  %1323 = vmatmul.mubr.f32.vlgmr.msra.gmra.mrb[8].mxu1 %v1254_v12  ;;  %v1693_v53 = vcombine.low %v3522_v21, %v3536_v45  ;;  %v1804_v3 = vcombine.high %v3417_v56, %v3539_v50  ;;  %v1914_v54 = vcombine.high %v3420_v57, %v3542_v5  ;;  %v2069_v11 = vld [vmem:[%s4156_s3 + $0x2d8] sm:$0xff]  ;;  %v2100_v12 = vld [vmem:[%s4156_s3 + $0x3d0] sm:$0xff]  ;;  %v2111_v43 = vld [vmem:[%s4156_s3 + $0x428] sm:$0xff] }
 0x11a   :  { %2646 = vmatpush3.bf16.msra.mxu0 %v2645_v31  ;;  %2678 = vmatpush3.bf16.msra.mxu1 %v2677_v32  ;;  %v2681_v55 = vpack.c.bf16 %v2077_v22, %v2076_v18  ;;  %v1803_v33 = vcombine.low %v3417_v56, %v3539_v50  ;;  %v1913_v7 = vcombine.low %v3420_v57, %v3542_v5  ;;  %v2079_v31 = vld [vmem:[%s4156_s3 + $0x328] sm:$0xff]  ;;  %v2064_v32 = vld [vmem:[%s4156_s3 + $0x2b0] sm:$0xff]  ;;  %v2206_v21 = vld [vmem:[%s4156_s3 + $0x720] sm:$0xff] }
 0x11b   :  { %1431 = vmatprep.mubr.f32.mxu0 %v1364_v16  ;;  %1541 = vmatprep.mubr.f32.mxu1 %v1474_v17  ;;  %v2651_v8 = vpack.c.bf16 %v2063_v41, %v2062_v44  ;;  %v2683_v9 = vpack.c.bf16 %v2095_v46, %v2094_v42  ;;  %v2653_v13 = vpack.c.bf16 %v2047_v62, %v2046_v61  ;;  %v2101_v16 = vld [vmem:[%s4156_s3 + $0x3d8] sm:$0xff]  ;;  %v2052_v22 = vld [vmem:[%s4156_s3 + $0x250] sm:$0xff]  ;;  %v2070_v61 = vld [vmem:[%s4156_s3 + $0x2e0] sm:$0xff] }
 0x11c   :  { %2648 = vmatprep.subr.bf16.mxu0 %v2647_v34  ;;  %2680 = vmatprep.subr.bf16.mxu1 %v2679_v48  ;;  %v2685_v14 = vpack.c.bf16 %v2079_v31, %v2078_v30  ;;  %v2655_v34 = vpack.c.bf16 %v2065_v58, %v2064_v32  ;;  %v2687_v48 = vpack.c.bf16 %v2097_v19, %v2096_v63  ;;  %v2053_v44 = vld [vmem:[%s4156_s3 + $0x258] sm:$0xff]  ;;  %v2084_v46 = vld [vmem:[%s4156_s3 + $0x350] sm:$0xff]  ;;  %v2071_v62 = vld [vmem:[%s4156_s3 + $0x2e8] sm:$0xff] }
 0x11d   :  { %v2657_v0 = vpack.c.bf16 %v2049_v23, %v2048_v15  ;;  %v2689_v1 = vpack.c.bf16 %v2081_v29, %v2080_v24  ;;  %v2691_v4 = vpack.c.bf16 %v2099_v39, %v2098_v38  ;;  %v2661_v17 = vpack.c.bf16 %v2051_v2, %v2050_v59  ;;  %v2054_v32 = vld [vmem:[%s4156_s3 + $0x260] sm:$0xff]  ;;  %v2055_v58 = vld [vmem:[%s4156_s3 + $0x268] sm:$0xff]  ;;  %v2072_v15 = vld [vmem:[%s4156_s3 + $0x2f0] sm:$0xff] }
 0x11e   :  { %2650 = vmatpush3.bf16.msra.mxu0 %v2649_v49  ;;  %2682 = vmatpush3.bf16.msra.mxu1 %v2681_v55  ;;  %v2066_v49 = vld [vmem:[%s4156_s3 + $0x2c0] sm:$0xff]  ;;  %v2693_v18 = vpack.c.bf16 %v2083_v6, %v2082_v20  ;;  %v2663_v41 = vpack.c.bf16 %v2069_v11, %v2068_v10  ;;  %v2695_v42 = vpack.c.bf16 %v2101_v16, %v2100_v12  ;;  %v2085_v55 = vld [vmem:[%s4156_s3 + $0x358] sm:$0xff]  ;;  %v2123_v2 = vld [vmem:[%s4156_s3 + $0x488] sm:$0xff] }
 0x11f   :  { %2652 = vmatprep.subr.bf16.mxu0 %v2651_v8  ;;  %2684 = vmatprep.subr.bf16.mxu1 %v2683_v9  ;;  %v2659_v60 = vpack.c.bf16 %v2067_v27, %v2066_v49  ;;  %v2102_v8 = vld [vmem:[%s4156_s3 + $0x3e0] sm:$0xff]  ;;  %v2103_v9 = vld [vmem:[%s4156_s3 + $0x3e8] sm:$0xff]  ;;  %v2665_v30 = vpack.c.bf16 %v2053_v44, %v2052_v22  ;;  %v2697_v31 = vpack.c.bf16 %v2085_v55, %v2084_v46  ;;  %v2073_v23 = vld [vmem:[%s4156_s3 + $0x2f8] sm:$0xff] }
 0x120   :  { %v2667_v63 = vpack.c.bf16 %v2071_v62, %v2070_v61  ;;  %v2699_v19 = vpack.c.bf16 %v2103_v9, %v2102_v8  ;;  %v2669_v24 = vpack.c.bf16 %v2055_v58, %v2054_v32  ;;  %v2056_v49 = vld [vmem:[%s4156_s3 + $0x270] sm:$0xff]  ;;  %v2057_v27 = vld [vmem:[%s4156_s3 + $0x278] sm:$0xff]  ;;  %v2671_v38 = vpack.c.bf16 %v2073_v23, %v2072_v15  ;;  %v2122_v59 = vld [vmem:[%s4156_s3 + $0x480] sm:$0xff] }
 0x121   :  { %v2673_v20 = vpack.c.bf16 %v2057_v27, %v2056_v49  ;;  %v2707_v10 = vpack.c.bf16 %v2123_v2, %v2122_v59  ;;  %v2106_v12 = vld [vmem:[%s4156_s3 + $0x400] sm:$0xff]  ;;  %v2107_v16 = vld [vmem:[%s4156_s3 + $0x408] sm:$0xff]  ;;  %v2124_v22 = vld [vmem:[%s4156_s3 + $0x490] sm:$0xff] }
 0x122   :  { %2654 = vmatpush3.bf16.msra.mxu0 %v2653_v13  ;;  %2686 = vmatpush3.bf16.msra.mxu1 %v2685_v14  ;;  %v2086_v13 = vld [vmem:[%s4156_s3 + $0x360] sm:$0xff]  ;;  %v2087_v14 = vld [vmem:[%s4156_s3 + $0x368] sm:$0xff]  ;;  %v2125_v44 = vld [vmem:[%s4156_s3 + $0x498] sm:$0xff]  ;;  %v2709_v46 = vpack.c.bf16 %v2107_v16, %v2106_v12 }
 0x123   :  { %2656 = vmatprep.subr.bf16.mxu0 %v2655_v34  ;;  %2688 = vmatprep.subr.bf16.mxu1 %v2687_v48  ;;  %v2104_v34 = vld [vmem:[%s4156_s3 + $0x3f0] sm:$0xff]  ;;  %v2105_v48 = vld [vmem:[%s4156_s3 + $0x3f8] sm:$0xff]  ;;  %v2701_v29 = vpack.c.bf16 %v2087_v14, %v2086_v13  ;;  %v2711_v9 = vpack.c.bf16 %v2125_v44, %v2124_v22  ;;  %v2126_v32 = vld [vmem:[%s4156_s3 + $0x4a0] sm:$0xff] }
 0x124   :  { %v2703_v39 = vpack.c.bf16 %v2105_v48, %v2104_v34  ;;  %v2108_v61 = vld [vmem:[%s4156_s3 + $0x410] sm:$0xff]  ;;  %v2109_v62 = vld [vmem:[%s4156_s3 + $0x418] sm:$0xff]  ;;  %v2127_v58 = vld [vmem:[%s4156_s3 + $0x4a8] sm:$0xff]  ;;  %v2717_v34 = vpack.c.bf16 %v2111_v43, %v2110_v26 }
 0x125   :  { %v2140_v8 = vld [vmem:[%s4156_s3 + $0x510] sm:$0xff]  ;;  %v2713_v13 = vpack.c.bf16 %v2109_v62, %v2108_v61  ;;  %v2715_v37 = vpack.c.bf16 %v2127_v58, %v2126_v32  ;;  %v2129_v14 = vld [vmem:[%s4156_s3 + $0x4b8] sm:$0xff]  ;;  %v2162_v59 = vld [vmem:[%s4156_s3 + $0x5c0] sm:$0xff] }
 0x126   :  { %2658 = vmatpush3.bf16.msra.mxu0 %v2657_v0  ;;  %2690 = vmatpush3.bf16.msra.mxu1 %v2689_v1  ;;  %v2088_v0 = vld [vmem:[%s4156_s3 + $0x370] sm:$0xff]  ;;  %v2089_v1 = vld [vmem:[%s4156_s3 + $0x378] sm:$0xff]  ;;  %v2163_v2 = vld [vmem:[%s4156_s3 + $0x5c8] sm:$0xff] }
 0x127   :  { %2660 = vmatprep.subr.bf16.mxu0 %v2659_v60  ;;  %2692 = vmatprep.subr.bf16.mxu1 %v2691_v4  ;;  %v2154_v60 = vld [vmem:[%s4156_s3 + $0x580] sm:$0xff]  ;;  %v2155_v4 = vld [vmem:[%s4156_s3 + $0x588] sm:$0xff]  ;;  %v2705_v6 = vpack.c.bf16 %v2089_v1, %v2088_v0  ;;  %v2160_v15 = vld [vmem:[%s4156_s3 + $0x5b0] sm:$0xff]  ;;  %v2755_v12 = vpack.c.bf16 %v2163_v2, %v2162_v59 }
 0x128   :  { %v2739_v11 = vpack.c.bf16 %v2155_v4, %v2154_v60  ;;  %v2161_v23 = vld [vmem:[%s4156_s3 + $0x5b8] sm:$0xff]  ;;  %v2144_v27 = vld [vmem:[%s4156_s3 + $0x530] sm:$0xff]  ;;  %v2130_v0 = vld [vmem:[%s4156_s3 + $0x4c0] sm:$0xff] }
 0x129   :  { %v2113_v49 = vld [vmem:[%s4156_s3 + $0x438] sm:$0xff]  ;;  %v2131_v1 = vld [vmem:[%s4156_s3 + $0x4c8] sm:$0xff]  ;;  %v2164_v22 = vld [vmem:[%s4156_s3 + $0x5d0] sm:$0xff] }
 0x12a   :  { %2662 = vmatpush3.bf16.msra.mxu0 %v2661_v17  ;;  %2694 = vmatpush3.bf16.msra.mxu1 %v2693_v18  ;;  %v2138_v17 = vld [vmem:[%s4156_s3 + $0x500] sm:$0xff]  ;;  %v2139_v18 = vld [vmem:[%s4156_s3 + $0x508] sm:$0xff]  ;;  %v2165_v44 = vld [vmem:[%s4156_s3 + $0x5d8] sm:$0xff] }
 0x12b   :  { %2664 = vmatprep.subr.bf16.mxu0 %v2663_v41  ;;  %2696 = vmatprep.subr.bf16.mxu1 %v2695_v42  ;;  %v2156_v41 = vld [vmem:[%s4156_s3 + $0x590] sm:$0xff]  ;;  %v2157_v42 = vld [vmem:[%s4156_s3 + $0x598] sm:$0xff]  ;;  %v2741_v55 = vpack.c.bf16 %v2139_v18, %v2138_v17  ;;  %v2147_v16 = vld [vmem:[%s4156_s3 + $0x548] sm:$0xff] }
 0x12c   :  { %v2132_v17 = vld [vmem:[%s4156_s3 + $0x4d0] sm:$0xff]  ;;  %v2133_v18 = vld [vmem:[%s4156_s3 + $0x4d8] sm:$0xff]  ;;  %v2166_v32 = vld [vmem:[%s4156_s3 + $0x5e0] sm:$0xff] }
 0x12d   :  { %v2117_v61 = vld [vmem:[%s4156_s3 + $0x458] sm:$0xff]  ;;  %v2148_v62 = vld [vmem:[%s4156_s3 + $0x550] sm:$0xff]  ;;  %v2167_v58 = vld [vmem:[%s4156_s3 + $0x5e8] sm:$0xff] }
 0x12e   :  { %2666 = vmatpush3.bf16.msra.mxu0 %v2665_v30  ;;  %2698 = vmatpush3.bf16.msra.mxu1 %v2697_v31  ;;  %v2743_v30 = vpack.c.bf16 %v2157_v42, %v2156_v41  ;;  %v2141_v31 = vld [vmem:[%s4156_s3 + $0x518] sm:$0xff]  ;;  %v2150_v26 = vld [vmem:[%s4156_s3 + $0x560] sm:$0xff]  ;;  %v2763_v43 = vpack.c.bf16 %v2167_v58, %v2166_v32  ;;  %v2175_v58 = vld [vmem:[%s4156_s3 + $0x628] sm:$0xff] }
 0x12f   :  { %2668 = vmatprep.subr.bf16.mxu0 %v2667_v63  ;;  %2700 = vmatprep.subr.bf16.mxu1 %v2699_v19  ;;  %v2158_v63 = vld [vmem:[%s4156_s3 + $0x5a0] sm:$0xff]  ;;  %v2159_v19 = vld [vmem:[%s4156_s3 + $0x5a8] sm:$0xff]  ;;  %v2745_v36 = vpack.c.bf16 %v2141_v31, %v2140_v8  ;;  %v2759_v8 = vpack.c.bf16 %v2165_v44, %v2164_v22  ;;  %v2221_v22 = vld [vmem:[%s4156_s3 + $0x798] sm:$0xff] }
 0x130   :  { %v2135_v31 = vld [vmem:[%s4156_s3 + $0x4e8] sm:$0xff] }
 0x132   :  { %2670 = vmatpush3.bf16.msra.mxu0 %v2669_v24  ;;  %2702 = vmatpush3.bf16.msra.mxu1 %v2701_v29  ;;  %v2112_v29 = vld [vmem:[%s4156_s3 + $0x430] sm:$0xff] }
 0x133   :  { %2672 = vmatprep.subr.bf16.mxu0 %v2671_v38  ;;  %2704 = vmatprep.subr.bf16.mxu1 %v2703_v39  ;;  %v2751_v38 = vpack.c.bf16 %v2161_v23, %v2160_v15  ;;  %v2145_v39 = vld [vmem:[%s4156_s3 + $0x538] sm:$0xff]  ;;  %v2721_v60 = vpack.c.bf16 %v2113_v49, %v2112_v29  ;;  %v2152_v29 = vld [vmem:[%s4156_s3 + $0x570] sm:$0xff] }
 0x134   :  { %v2753_v4 = vpack.c.bf16 %v2145_v39, %v2144_v27  ;;  %v2153_v27 = vld [vmem:[%s4156_s3 + $0x578] sm:$0xff]  ;;  %v2187_v39 = vld [vmem:[%s4156_s3 + $0x688] sm:$0xff] }
 0x135   :  { %v2769_v2 = vpack.c.bf16 %v2153_v27, %v2152_v29  ;;  %v2178_v29 = vld [vmem:[%s4156_s3 + $0x640] sm:$0xff] }
 0x136   :  { %2674 = vmatpush3.bf16.msra.mxu0 %v2673_v20  ;;  %2706 = vmatpush3.bf16.msra.mxu1 %v2705_v6  ;;  %v2723_v20 = vpack.c.bf16 %v2131_v1, %v2130_v0  ;;  %v2114_v6 = vld [vmem:[%s4156_s3 + $0x440] sm:$0xff]  ;;  %v2219_v1 = vld [vmem:[%s4156_s3 + $0x788] sm:$0xff] }
 0x137   :  { %2708 = vmatprep.subr.bf16.mxu0 %v2707_v10  ;;  %2740 = vmatprep.subr.bf16.mxu1 %v2739_v11  ;;  %v2115_v10 = vld [vmem:[%s4156_s3 + $0x448] sm:$0xff]  ;;  %v2146_v11 = vld [vmem:[%s4156_s3 + $0x540] sm:$0xff] }
 0x138   :  { %v2725_v41 = vpack.c.bf16 %v2115_v10, %v2114_v6  ;;  %v2757_v42 = vpack.c.bf16 %v2147_v16, %v2146_v11  ;;  %v2218_v0 = vld [vmem:[%s4156_s3 + $0x780] sm:$0xff]  ;;  %v2203_v11 = vld [vmem:[%s4156_s3 + $0x708] sm:$0xff]  ;;  %v2189_v16 = vld [vmem:[%s4156_s3 + $0x698] sm:$0xff] }
 0x139   :  { %1432 = vmatmul.mubr.f32.vlgmr.msra.gmra.mrb[10].mxu0 %v1363_v35  ;;  %1542 = vmatmul.mubr.f32.vlgmr.msra.gmra.mrb[10].mxu1 %v1473_v40  ;;  %v2142_v35 = vld [vmem:[%s4156_s3 + $0x520] sm:$0xff]  ;;  %v2747_v40 = vpack.c.bf16 %v2159_v19, %v2158_v63  ;;  %v2803_v6 = vpack.c.bf16 %v2219_v1, %v2218_v0  ;;  %v2196_v0 = vld [vmem:[%s4156_s3 + $0x6d0] sm:$0xff]  ;;  %v2197_v1 = vld [vmem:[%s4156_s3 + $0x6d8] sm:$0xff] }
 0x13a   :  { %2710 = vmatpush3.bf16.msra.mxu0 %v2709_v46  ;;  %1651 = vmatprep.mubr.f32.mxu0 %v1584_v47  ;;  %v2143_v47 = vld [vmem:[%s4156_s3 + $0x528] sm:$0xff]  ;;  %v2727_v46 = vpack.c.bf16 %v2133_v18, %v2132_v17  ;;  %v2202_v10 = vld [vmem:[%s4156_s3 + $0x700] sm:$0xff]  ;;  %v2220_v18 = vld [vmem:[%s4156_s3 + $0x790] sm:$0xff] }
 0x13b   :  { %2742 = vmatpush3.bf16.msra.mxu1 %v2741_v55  ;;  %1761 = vmatprep.mubr.f32.mxu1 %v1694_v51  ;;  %v2128_v51 = vld [vmem:[%s4156_s3 + $0x4b0] sm:$0xff]  ;;  %v2749_v48 = vpack.c.bf16 %v2143_v47, %v2142_v35  ;;  %v2151_v35 = vld [vmem:[%s4156_s3 + $0x568] sm:$0xff]  ;;  %v2137_v47 = vld [vmem:[%s4156_s3 + $0x4f8] sm:$0xff]  ;;  %v2805_v44 = vpack.c.bf16 %v2203_v11, %v2202_v10 }
 0x13c   :  { %2712 = vmatprep.subr.bf16.mxu0 %v2711_v9  ;;  %2744 = vmatprep.subr.bf16.mxu1 %v2743_v30  ;;  %v2719_v24 = vpack.c.bf16 %v2129_v14, %v2128_v51  ;;  %v2116_v55 = vld [vmem:[%s4156_s3 + $0x450] sm:$0xff]  ;;  %v2149_v9 = vld [vmem:[%s4156_s3 + $0x558] sm:$0xff]  ;;  %v2134_v30 = vld [vmem:[%s4156_s3 + $0x4e0] sm:$0xff]  ;;  %v2765_v23 = vpack.c.bf16 %v2151_v35, %v2150_v26 }
 0x13d   :  { %v2729_v63 = vpack.c.bf16 %v2117_v61, %v2116_v55  ;;  %v2761_v19 = vpack.c.bf16 %v2149_v9, %v2148_v62  ;;  %v2168_v51 = vld [vmem:[%s4156_s3 + $0x5f0] sm:$0xff]  ;;  %v2169_v14 = vld [vmem:[%s4156_s3 + $0x5f8] sm:$0xff]  ;;  %v2190_v62 = vld [vmem:[%s4156_s3 + $0x6a0] sm:$0xff]  ;;  %v2807_v9 = vpack.c.bf16 %v2221_v22, %v2220_v18 }
 0x13e   :  { %2714 = vmatpush3.bf16.msra.mxu0 %v2713_v13  ;;  %v2731_v13 = vpack.c.bf16 %v2135_v31, %v2134_v30  ;;  %v2767_v49 = vpack.c.bf16 %v2169_v14, %v2168_v51  ;;  %v2205_v61 = vld [vmem:[%s4156_s3 + $0x718] sm:$0xff]  ;;  %v2222_v30 = vld [vmem:[%s4156_s3 + $0x7a0] sm:$0xff]  ;;  %v2223_v31 = vld [vmem:[%s4156_s3 + $0x7a8] sm:$0xff] }
 0x13f   :  { %2746 = vmatpush3.bf16.msra.mxu1 %v2745_v36  ;;  %2716 = vmatprep.subr.bf16.mxu0 %v2715_v37  ;;  %v2118_v36 = vld [vmem:[%s4156_s3 + $0x460] sm:$0xff]  ;;  %v2119_v37 = vld [vmem:[%s4156_s3 + $0x468] sm:$0xff]  ;;  %v2811_v45 = vpack.c.bf16 %v2223_v31, %v2222_v30  ;;  %v2176_v26 = vld [vmem:[%s4156_s3 + $0x630] sm:$0xff] }
 0x140   :  { %2748 = vmatprep.subr.bf16.mxu1 %v2747_v40  ;;  %v2136_v40 = vld [vmem:[%s4156_s3 + $0x4f0] sm:$0xff]  ;;  %v2733_v15 = vpack.c.bf16 %v2119_v37, %v2118_v36  ;;  %v2194_v51 = vld [vmem:[%s4156_s3 + $0x6c0] sm:$0xff]  ;;  %v2195_v14 = vld [vmem:[%s4156_s3 + $0x6c8] sm:$0xff] }
 0x141   :  { %v2208_v35 = vld [vmem:[%s4156_s3 + $0x730] sm:$0xff]  ;;  %v2210_v27 = vld [vmem:[%s4156_s3 + $0x740] sm:$0xff]  ;;  %v2181_v10 = vld [vmem:[%s4156_s3 + $0x658] sm:$0xff] }
 0x142   :  { %2718 = vmatpush3.bf16.msra.mxu0 %v2717_v34  ;;  %v2735_v34 = vpack.c.bf16 %v2137_v47, %v2136_v40  ;;  %v2209_v47 = vld [vmem:[%s4156_s3 + $0x738] sm:$0xff]  ;;  %v2212_v11 = vld [vmem:[%s4156_s3 + $0x750] sm:$0xff]  ;;  %v2199_v18 = vld [vmem:[%s4156_s3 + $0x6e8] sm:$0xff] }
 0x143   :  { %2750 = vmatpush3.bf16.msra.mxu1 %v2749_v48  ;;  %2720 = vmatprep.subr.bf16.mxu0 %v2719_v24  ;;  %v2120_v48 = vld [vmem:[%s4156_s3 + $0x470] sm:$0xff]  ;;  %v2121_v24 = vld [vmem:[%s4156_s3 + $0x478] sm:$0xff]  ;;  %v2230_v22 = vld [vmem:[%s4156_s3 + $0x7e0] sm:$0xff] }
 0x144   :  { %2752 = vmatprep.subr.bf16.mxu1 %v2751_v38  ;;  %v2186_v38 = vld [vmem:[%s4156_s3 + $0x680] sm:$0xff]  ;;  %v2737_v59 = vpack.c.bf16 %v2121_v24, %v2120_v48  ;;  %v2817_v48 = vpack.c.bf16 %v2209_v47, %v2208_v35  ;;  %v2787_v24 = vpack.c.bf16 %v2195_v14, %v2194_v51  ;;  %v2200_v30 = vld [vmem:[%s4156_s3 + $0x6f0] sm:$0xff]  ;;  %v2201_v31 = vld [vmem:[%s4156_s3 + $0x6f8] sm:$0xff] }
 0x146   :  { %2722 = vmatpush3.bf16.msra.mxu0 %v2721_v60  ;;  %v2771_v60 = vpack.c.bf16 %v2187_v39, %v2186_v38  ;;  %v2211_v39 = vld [vmem:[%s4156_s3 + $0x748] sm:$0xff] }
 0x147   :  { %2754 = vmatpush3.bf16.msra.mxu1 %v2753_v4  ;;  %2724 = vmatprep.subr.bf16.mxu0 %v2723_v20  ;;  %v2170_v4 = vld [vmem:[%s4156_s3 + $0x600] sm:$0xff]  ;;  %v2171_v20 = vld [vmem:[%s4156_s3 + $0x608] sm:$0xff] }
 0x148   :  { %2756 = vmatprep.subr.bf16.mxu1 %v2755_v12  ;;  %v2188_v12 = vld [vmem:[%s4156_s3 + $0x690] sm:$0xff]  ;;  %v2773_v17 = vpack.c.bf16 %v2171_v20, %v2170_v4  ;;  %v2821_v4 = vpack.c.bf16 %v2211_v39, %v2210_v27  ;;  %v2791_v20 = vpack.c.bf16 %v2197_v1, %v2196_v0 }
 0x149   :  { %v2775_v55 = vpack.c.bf16 %v2189_v16, %v2188_v12  ;;  %v2213_v16 = vld [vmem:[%s4156_s3 + $0x758] sm:$0xff] }
 0x14a   :  { %2726 = vmatpush3.bf16.msra.mxu0 %v2725_v41  ;;  %v2172_v41 = vld [vmem:[%s4156_s3 + $0x610] sm:$0xff] }
 0x14b   :  { %2758 = vmatpush3.bf16.msra.mxu1 %v2757_v42  ;;  %2728 = vmatprep.subr.bf16.mxu0 %v2727_v46  ;;  %v2173_v42 = vld [vmem:[%s4156_s3 + $0x618] sm:$0xff]  ;;  %v2204_v46 = vld [vmem:[%s4156_s3 + $0x710] sm:$0xff] }
 0x14c   :  { %2760 = vmatprep.subr.bf16.mxu1 %v2759_v8  ;;  %v2191_v8 = vld [vmem:[%s4156_s3 + $0x6a8] sm:$0xff]  ;;  %v2777_v32 = vpack.c.bf16 %v2173_v42, %v2172_v41  ;;  %v2809_v25 = vpack.c.bf16 %v2205_v61, %v2204_v46  ;;  %v2825_v42 = vpack.c.bf16 %v2213_v16, %v2212_v11 }
 0x14d   :  { %v2779_v28 = vpack.c.bf16 %v2191_v8, %v2190_v62  ;;  %v2183_v61 = vld [vmem:[%s4156_s3 + $0x668] sm:$0xff]  ;;  %v2214_v62 = vld [vmem:[%s4156_s3 + $0x760] sm:$0xff] }
 0x14e   :  { %2730 = vmatpush3.bf16.msra.mxu0 %v2729_v63  ;;  %v2193_v63 = vld [vmem:[%s4156_s3 + $0x6b8] sm:$0xff] }
 0x14f   :  { %2762 = vmatpush3.bf16.msra.mxu1 %v2761_v19  ;;  %2732 = vmatprep.subr.bf16.mxu0 %v2731_v13  ;;  %v2224_v19 = vld [vmem:[%s4156_s3 + $0x7b0] sm:$0xff] }
 0x150   :  { %2764 = vmatprep.subr.bf16.mxu1 %v2763_v43  ;;  %v2177_v43 = vld [vmem:[%s4156_s3 + $0x638] sm:$0xff] }
 0x152   :  { %2734 = vmatpush3.bf16.msra.mxu0 %v2733_v15  ;;  %v2226_v15 = vld [vmem:[%s4156_s3 + $0x7c0] sm:$0xff] }
 0x153   :  { %2766 = vmatpush3.bf16.msra.mxu1 %v2765_v23  ;;  %2736 = vmatprep.subr.bf16.mxu0 %v2735_v34  ;;  %v2227_v23 = vld [vmem:[%s4156_s3 + $0x7c8] sm:$0xff]  ;;  %v2785_v34 = vpack.c.bf16 %v2177_v43, %v2176_v26 }
 0x154   :  { %2768 = vmatprep.subr.bf16.mxu1 %v2767_v49  ;;  %v2179_v49 = vld [vmem:[%s4156_s3 + $0x648] sm:$0xff]  ;;  %v2819_v38 = vpack.c.bf16 %v2227_v23, %v2226_v15 }
 0x156   :  { %2738 = vmatpush3.bf16.msra.mxu0 %v2737_v59  ;;  %v2228_v59 = vld [vmem:[%s4156_s3 + $0x7d0] sm:$0xff] }
 0x157   :  { %2770 = vmatpush3.bf16.msra.mxu1 %v2769_v2  ;;  %2772 = vmatprep.subr.bf16.mxu0 %v2771_v60  ;;  %v2229_v2 = vld [vmem:[%s4156_s3 + $0x7d8] sm:$0xff]  ;;  %v2789_v60 = vpack.c.bf16 %v2179_v49, %v2178_v29 }
 0x158   :  { %2804 = vmatprep.subr.bf16.mxu1 %v2803_v6  ;;  %v2180_v6 = vld [vmem:[%s4156_s3 + $0x650] sm:$0xff]  ;;  %v2823_v12 = vpack.c.bf16 %v2229_v2, %v2228_v59 }
 0x159   :  { %1652 = vmatmul.mubr.f32.vlgmr.msra.gmra.mrb[12].mxu0 %v1583_v52  ;;  %v2174_v52 = vld [vmem:[%s4156_s3 + $0x620] sm:$0xff]  ;;  %v2793_v41 = vpack.c.bf16 %v2181_v10, %v2180_v6 }
 0x15a   :  { %1762 = vmatmul.mubr.f32.vlgmr.msra.gmra.mrb[12].mxu1 %v1693_v53  ;;  %2774 = vmatpush3.bf16.msra.mxu0 %v2773_v17  ;;  %v2207_v53 = vld [vmem:[%s4156_s3 + $0x728] sm:$0xff]  ;;  %v2781_v13 = vpack.c.bf16 %v2175_v58, %v2174_v52  ;;  %v2198_v17 = vld [vmem:[%s4156_s3 + $0x6e0] sm:$0xff]  ;;  %v2799_v58 = vpack.c.bf16 %v2201_v31, %v2200_v30 }
 0x15b   :  { %1871 = vmatprep.mubr.f32.mxu0 %v1804_v3  ;;  %2806 = vmatpush3.bf16.msra.mxu1 %v2805_v44  ;;  %v2192_v3 = vld [vmem:[%s4156_s3 + $0x6b0] sm:$0xff]  ;;  %v2813_v36 = vpack.c.bf16 %v2207_v53, %v2206_v21  ;;  %v2231_v44 = vld [vmem:[%s4156_s3 + $0x7e8] sm:$0xff]  ;;  %v2795_v46 = vpack.c.bf16 %v2199_v18, %v2198_v17 }
 0x15c   :  { %1981 = vmatprep.mubr.f32.mxu1 %v1914_v54  ;;  %2776 = vmatprep.subr.bf16.mxu0 %v2775_v55  ;;  %v2225_v54 = vld [vmem:[%s4156_s3 + $0x7b8] sm:$0xff]  ;;  %v2783_v37 = vpack.c.bf16 %v2193_v63, %v2192_v3  ;;  %v2182_v55 = vld [vmem:[%s4156_s3 + $0x660] sm:$0xff]  ;;  %v2827_v8 = vpack.c.bf16 %v2231_v44, %v2230_v22  ;;  %v2184_v21 = vld [vmem:[%s4156_s3 + $0x670] sm:$0xff] }
 0x15d   :  { %2808 = vmatprep.subr.bf16.mxu1 %v2807_v9  ;;  %v2815_v40 = vpack.c.bf16 %v2225_v54, %v2224_v19  ;;  %v2215_v9 = vld [vmem:[%s4156_s3 + $0x768] sm:$0xff]  ;;  %v2216_v3 = vld [vmem:[%s4156_s3 + $0x770] sm:$0xff]  ;;  %v2217_v63 = vld [vmem:[%s4156_s3 + $0x778] sm:$0xff] }
 0x15e   :  { %2778 = vmatpush3.bf16.msra.mxu0 %v2777_v32  ;;  %v2232_v32 = vld [vmem:[%s4156_s3 + $0x7f0] sm:$0xff]  ;;  %v2829_v52 = vpack.c.bf16 %v2215_v9, %v2214_v62  ;;  %v2833_v54 = vpack.c.bf16 %v2217_v63, %v2216_v3 }
 0x15f   :  { %2810 = vmatpush3.bf16.msra.mxu1 %v2809_v25  ;;  %2780 = vmatprep.subr.bf16.mxu0 %v2779_v28  ;;  %v2233_v25 = vld [vmem:[%s4156_s3 + $0x7f8] sm:$0xff]  ;;  %v2797_v28 = vpack.c.bf16 %v2183_v61, %v2182_v55 }
 0x160   :  { %2812 = vmatprep.subr.bf16.mxu1 %v2811_v45  ;;  %v2185_v45 = vld [vmem:[%s4156_s3 + $0x678] sm:$0xff]  ;;  %v2831_v53 = vpack.c.bf16 %v2233_v25, %v2232_v32 }
 0x161   :  { %v2801_v19 = vpack.c.bf16 %v2185_v45, %v2184_v21 }
 0x162   :  { %2782 = vmatpush3.bf16.msra.mxu0 %v2781_v13 }
 0x163   :  { %2814 = vmatpush3.bf16.msra.mxu1 %v2813_v36  ;;  %2784 = vmatprep.subr.bf16.mxu0 %v2783_v37 }
 0x164   :  { %2816 = vmatprep.subr.bf16.mxu1 %v2815_v40 }
 0x166   :  { %2786 = vmatpush3.bf16.msra.mxu0 %v2785_v34 }
 0x167   :  { %2818 = vmatpush3.bf16.msra.mxu1 %v2817_v48  ;;  %2788 = vmatprep.subr.bf16.mxu0 %v2787_v24 }
 0x168   :  { %2820 = vmatprep.subr.bf16.mxu1 %v2819_v38 }
 0x16a   :  { %2790 = vmatpush3.bf16.msra.mxu0 %v2789_v60  ;;  %v2234_v60 = vld [vmem:[%s4157_s4] ss:$0 sm:$0xff] }
 0x16b   :  { %2822 = vmatpush3.bf16.msra.mxu1 %v2821_v4  ;;  %2792 = vmatprep.subr.bf16.mxu0 %v2791_v20 }
 0x16c   :  { %2824 = vmatprep.subr.bf16.mxu1 %v2823_v12 }
 0x16e   :  { %2794 = vmatpush3.bf16.msra.mxu0 %v2793_v41 }
 0x16f   :  { %2826 = vmatpush3.bf16.msra.mxu1 %v2825_v42  ;;  %2796 = vmatprep.subr.bf16.mxu0 %v2795_v46 }
 0x170   :  { %2828 = vmatprep.subr.bf16.mxu1 %v2827_v8 }
 0x172   :  { %2798 = vmatpush3.bf16.msra.mxu0 %v2797_v28 }
 0x173   :  { %2830 = vmatpush3.bf16.msra.mxu1 %v2829_v52  ;;  %2800 = vmatprep.subr.bf16.mxu0 %v2799_v58 }
 0x174   :  { %2832 = vmatprep.subr.bf16.mxu1 %v2831_v53 }
 0x176   :  { %2802 = vmatpush3.bf16.msra.mxu0 %v2801_v19 }
 0x177   :  { %2834 = vmatpush3.bf16.msra.mxu1 %v2833_v54 }
 0x179   :  { %1872 = vmatmul.mubr.f32.vlgmr.msra.gmra.mrb[14].mxu0 %v1803_v33 }
 0x17a   :  { %1982 = vmatmul.mubr.f32.vlgmr.msra.gmra.mrb[14].mxu1 %v1913_v7 }
 0x1ec   :  { %v2267_v13 = vpop.f32.mrb[8].mxu0  ;;  %v2302_v36 = vpop.f32.mrb[8].mxu1 }
 0x1ed   :  { %v2268_v37 = vpop.f32.mrb[9].mxu0  ;;  %v2303_v26 = vpop.f32.mrb[9].mxu1 }
 0x1ee   :  { %v2269_v43 = vadd.f32 %v2268_v37, %v2267_v13  ;;  %v2304_v35 = vadd.f32 %v2303_v26, %v2302_v36 }
 0x1f0   :  { %v1325_v40 = vadd.f32 %v2304_v35, %v2269_v43 }
 0x20c   :  { %v2337_v47 = vpop.f32.mrb[10].mxu0  ;;  %v2372_v51 = vpop.f32.mrb[10].mxu1 }
 0x20d   :  { %v2338_v14 = vpop.f32.mrb[11].mxu0  ;;  %v2373_v15 = vpop.f32.mrb[11].mxu1 }
 0x20e   :  { %v2339_v23 = vadd.f32 %v2338_v14, %v2337_v47  ;;  %v2374_v34 = vadd.f32 %v2373_v15, %v2372_v51 }
 0x210   :  { %v1437_v48 = vadd.f32 %v2339_v23, %v1325_v40 }
 0x212   :  { %v1547_v56 = vadd.f32 %v2374_v34, %v1437_v48 }
 0x22c   :  { %v2407_v50 = vpop.f32.mrb[12].mxu0 }
 0x22d   :  { %v2442_v33 = vpop.f32.mrb[12].mxu1  ;;  %v2408_v24 = vpop.f32.mrb[13].mxu0 }
 0x22e   :  { %v2409_v57 = vadd.f32 %v2408_v24, %v2407_v50  ;;  %v2443_v5 = vpop.f32.mrb[13].mxu1 }
 0x22f   :  { %v2444_v7 = vadd.f32 %v2443_v5, %v2442_v33 }
 0x230   :  { %v1657_v29 = vadd.f32 %v2409_v57, %v1547_v56 }
 0x232   :  { %v1767_v49 = vadd.f32 %v2444_v7, %v1657_v29 }
 0x24c   :  { %v2477_v27 = vpop.f32.mrb[14].mxu0 }
 0x24d   :  { %v2512_v38 = vpop.f32.mrb[14].mxu1  ;;  %v2478_v39 = vpop.f32.mrb[15].mxu0 }
 0x24e   :  { %v2479_v0 = vadd.f32 %v2478_v39, %v2477_v27  ;;  %v2513_v1 = vpop.f32.mrb[15].mxu1 }
 0x24f   :  { %v2514_v59 = vadd.f32 %v2513_v1, %v2512_v38 }
 0x250   :  { %v1877_v2 = vadd.f32 %v2479_v0, %v1767_v49 }
 0x252   :  { %v1987_v4 = vadd.f32 %v2514_v59, %v1877_v2 }
 0x254   :  { %v1995_v20 = vadd.f32 %v2234_v60, %v1987_v4 }
 0x256   :  { %1997 = vst.msk [vmem:[%s4158_s5] sm:$0xff] %vm1996_vm1, %v1995_v20 }

</bundles_post_ra>
